<compile_context>
chip_gen: v5e
topology: v5e:2x2
jax: 0.10.0
libtpu: 0.0.40
codegen_flags: <defaults>
</compile_context>

<pallas_src>
import functools

import jax
import jax.numpy as jnp
from jax.experimental import pallas as pl
from jax.experimental.pallas import tpu as pltpu


def _mha_kernel(q_ref, k_ref, v_ref,
                wq_ref, wk_ref, wv_ref, wfc_ref,
                gamma_ref, beta_ref,
                o_ref,
                k_sc, v_sc,
                *, heads, eps):
    qi = pl.program_id(1)

    # ---- K / V projection: once per batch element, kept resident across q tiles.
    @pl.when(qi == 0)
    def _():
        xk = k_ref[0].astype(jnp.bfloat16)             # (S, D)
        xv = v_ref[0].astype(jnp.bfloat16)             # (S, D)
        for h in range(heads):                         # unrolled; static head index
            k_sc[h] = jnp.dot(xk, wk_ref[h],
                              preferred_element_type=jnp.float32
                              ).astype(jnp.bfloat16)   # (S, d_k)
            v_sc[h] = jnp.dot(xv, wv_ref[h],
                              preferred_element_type=jnp.float32
                              ).astype(jnp.bfloat16)   # (S, d_k)

    x_q = q_ref[0]                                     # (tq, D) f32 -- also the residual
    xq_bf = x_q.astype(jnp.bfloat16)

    out = jnp.zeros(x_q.shape, jnp.float32)            # (tq, D) f32 accumulator
    for h in range(heads):
        # Per-head Q projection; the 1/d_k attention scale is folded into wq.
        qh = jnp.dot(xq_bf, wq_ref[h],
                     preferred_element_type=jnp.float32)             # (tq, d_k) f32
        kh = k_sc[h]                                                 # (S, d_k) bf16
        vh = v_sc[h]                                                 # (S, d_k) bf16

        # scores: contract d_k of both operands (no transpose materialized).
        s = jax.lax.dot_general(qh.astype(jnp.bfloat16), kh,
                                dimension_numbers=(((1,), (1,)), ((), ())),
                                preferred_element_type=jnp.float32)  # (tq, S) f32

        # Numerically stable softmax in f32; divide goes to the EUP slot.
        m = jnp.max(s, axis=-1, keepdims=True)
        p = jnp.exp(s - m)
        denom = jnp.sum(p, axis=-1, keepdims=True)
        p = p * pl.reciprocal(denom, approx=True)

        ctx = jnp.dot(p.astype(jnp.bfloat16), vh,
                      preferred_element_type=jnp.float32)            # (tq, d_k) f32
        # Per-head slice of the output projection; accumulate -> no concatenate.
        out = out + jnp.dot(ctx.astype(jnp.bfloat16), wfc_ref[h],
                            preferred_element_type=jnp.float32)      # (tq, D) f32

    # ---- Residual + LayerNorm (f32); gamma fused into the rsqrt factor.
    y = out + x_q
    mean = jnp.mean(y, axis=-1, keepdims=True)
    c = y - mean
    var = jnp.mean(c * c, axis=-1, keepdims=True)
    scale = jax.lax.rsqrt(var + eps) * gamma_ref[...]                # (tq,1)*(1,D)->(tq,D)
    o_ref[0] = (c * scale + beta_ref[...]).astype(o_ref.dtype)


def multi_head_attention(q, k, v, params, *, heads, q_tile=256):
    """q, k, v: [B, S, D] float32. params: PyTorch-layout weights (Linear stores [out, in])."""
    B, S, D = q.shape
    assert D % heads == 0, "dim must be divisible by heads"
    d_k = D // heads

    tq = min(q_tile, S)
    if S % tq != 0:          # keep the grid exact; fall back to a single query tile
        tq = S
    n_q = S // tq

    f32, bf16 = jnp.float32, jnp.bfloat16

    # Head-major weights prepared in the wrapper (free layout plumbing outside the kernel):
    #   wq/wk/wv: (H, D, d_k)  -> per-head projection is x @ w[h]
    #   wfc     : (H, d_k, D)  -> output projection accumulated per head
    # The 1/d_k attention scale is folded into wq.
    def to_heads(w):                      # PyTorch [out, in] -> (H, D_in, d_k)
        return w.T.reshape(D, heads, d_k).transpose(1, 0, 2)

    wq_h = (to_heads(params["wq"]) / float(d_k)).astype(bf16)
    wk_h = to_heads(params["wk"]).astype(bf16)
    wv_h = to_heads(params["wv"]).astype(bf16)
    wfc_h = params["wfc"].T.reshape(heads, d_k, D).astype(bf16)
    gamma = params["gamma"].reshape(1, D).astype(f32)
    beta = params["beta"].reshape(1, D).astype(f32)

    kernel = functools.partial(_mha_kernel, heads=heads, eps=1e-8)

    q_spec = pl.BlockSpec((1, tq, D), lambda b, i: (b, i, 0))
    kv_spec = pl.BlockSpec((1, S, D), lambda b, i: (b, 0, 0))
    out_spec = pl.BlockSpec((1, tq, D), lambda b, i: (b, i, 0))

    # Rough cost hint for the XLA scheduler.
    cost = pl.CostEstimate(
        flops=int(B * (8 * S * D * D + 4 * S * S * D)),
        transcendentals=int(B * heads * S * S),
        bytes_accessed=int(16 * B * S * D + 8 * D * D + 8 * D),
    )

    def build(single_buffer_weights):
        extra = {}
        if single_buffer_weights:
            # Grid-invariant blocks -> one VMEM buffer is enough (no double-buffer waste).
            extra = dict(pipeline_mode=pl.Buffered(1))

        def const_spec(shape):
            nd = len(shape)
            return pl.BlockSpec(shape, lambda b, i: (0,) * nd, **extra)

        return pl.pallas_call(
            kernel,
            out_shape=jax.ShapeDtypeStruct((B, S, D), q.dtype),
            grid_spec=pltpu.PrefetchScalarGridSpec(
                num_scalar_prefetch=0,
                grid=(B, n_q),
                in_specs=[q_spec, kv_spec, kv_spec,
                          const_spec((heads, D, d_k)),
                          const_spec((heads, D, d_k)),
                          const_spec((heads, D, d_k)),
                          const_spec((heads, d_k, D)),
                          const_spec((1, D)),
                          const_spec((1, D))],
                out_specs=out_spec,
                scratch_shapes=[pltpu.VMEM((heads, S, d_k), bf16),
                                pltpu.VMEM((heads, S, d_k), bf16)]),
            compiler_params=pltpu.CompilerParams(
                dimension_semantics=("parallel", "arbitrary"),
                vmem_limit_bytes=64 * 1024 * 1024),
            cost_estimate=cost,
        )

    args = (q, k, v, wq_h, wk_h, wv_h, wfc_h, gamma, beta)
    try:
        out = build(True)(*args)
        return jax.block_until_ready(out)
    except Exception:
        # Fallback: default double-buffered weight specs if pl.Buffered(1)
        # single-buffering is not supported by this JAX version.
        return build(False)(*args)


def _reference(q, k, v, params, *, heads):
    """Pure-JAX f32 reference mirroring the PyTorch forward (eval mode, mask=None)."""
    B, S, D = q.shape
    d_k = D // heads
    Q = q @ params["wq"].T
    K = k @ params["wk"].T
    V = v @ params["wv"].T
    Q = Q.reshape(B, S, heads, d_k).transpose(0, 2, 1, 3)
    K = K.reshape(B, S, heads, d_k).transpose(0, 2, 1, 3)
    V = V.reshape(B, S, heads, d_k).transpose(0, 2, 1, 3)
    scores = jnp.einsum("bhqd,bhkd->bhqk", Q, K) / d_k
    p = jax.nn.softmax(scores, axis=-1)
    ctx = jnp.einsum("bhqk,bhkd->bhqd", p, V)
    ctx = ctx.transpose(0, 2, 1, 3).reshape(B, S, D)
    out = ctx @ params["wfc"].T
    y = out + q
    mean = jnp.mean(y, axis=-1, keepdims=True)
    var = jnp.mean((y - mean) ** 2, axis=-1, keepdims=True)
    normed = (y - mean) / jnp.sqrt(var + 1e-8)
    return normed * params["gamma"] + params["beta"]


if __name__ == "__main__":
    B, S, D, H = 2, 16, 32, 4

    key = jax.random.PRNGKey(0)
    kq, kk, kv, k1, k2, k3, k4, k5, k6 = jax.random.split(key, 9)

    q = jax.random.normal(kq, (B, S, D), dtype=jnp.float32)
    k = jax.random.normal(kk, (B, S, D), dtype=jnp.float32)
    v = jax.random.normal(kv, (B, S, D), dtype=jnp.float32)

    scale = 1.0 / jnp.sqrt(jnp.float32(D))
    params = {
        "wq": jax.random.normal(k1, (D, D), dtype=jnp.float32) * scale,
        "wk": jax.random.normal(k2, (D, D), dtype=jnp.float32) * scale,
        "wv": jax.random.normal(k3, (D, D), dtype=jnp.float32) * scale,
        "wfc": jax.random.normal(k4, (D, D), dtype=jnp.float32) * scale,
        "gamma": 1.0 + 0.1 * jax.random.normal(k5, (D,), dtype=jnp.float32),
        "beta": 0.1 * jax.random.normal(k6, (D,), dtype=jnp.float32),
    }

    # q_tile=8 -> grid (B=2, S//tq=2): exercises both the batch axis and query tiling.
    out = multi_head_attention(q, k, v, params, heads=H, q_tile=8)
    out = jax.block_until_ready(out)

    ref = _reference(q, k, v, params, heads=H)
    # bf16 MXU operands (f32 accumulation / f32 softmax & LayerNorm) -> loosened tolerance.
    assert jnp.allclose(out, ref, atol=3e-2, rtol=3e-2), "mismatch vs reference"

    print("KERNEL_OK")
</pallas_src>

<mosaic_0001>
module attributes {stable_mosaic.version = 11 : i64} {
  func.func @_mha_kernel(%arg0: i32, %arg1: i32, %arg2: memref<1x8x32xf32, #tpu.memory_space<vmem>>, %arg3: memref<1x16x32xf32, #tpu.memory_space<vmem>>, %arg4: memref<1x16x32xf32, #tpu.memory_space<vmem>>, %arg5: memref<4x32x8xbf16, #tpu.memory_space<vmem>>, %arg6: memref<4x32x8xbf16, #tpu.memory_space<vmem>>, %arg7: memref<4x32x8xbf16, #tpu.memory_space<vmem>>, %arg8: memref<4x8x32xbf16, #tpu.memory_space<vmem>>, %arg9: memref<1x32xf32, #tpu.memory_space<vmem>>, %arg10: memref<1x32xf32, #tpu.memory_space<vmem>>, %arg11: memref<1x8x32xf32, #tpu.memory_space<vmem>>, %arg12: memref<4x16x8xbf16, #tpu.memory_space<vmem>>, %arg13: memref<4x16x8xbf16, #tpu.memory_space<vmem>>) attributes {dimension_semantics = [#tpu.dimension_semantics<parallel>, #tpu.dimension_semantics<arbitrary>], iteration_bounds = array<i64: 2, 2>, scalar_prefetch = 0 : i64, scratch_operands = 2 : i64, tpu.core_type = #tpu.core_type<tc>, window_params = [{transform_indices = @transform_0, window_bounds = array<i64: 1, 8, 32>}, {transform_indices = @transform_1, window_bounds = array<i64: 1, 16, 32>}, {transform_indices = @transform_2, window_bounds = array<i64: 1, 16, 32>}, {pipeline_mode = #tpu.pipeline_mode<synchronous>, transform_indices = @transform_3, window_bounds = array<i64: 4, 32, 8>}, {pipeline_mode = #tpu.pipeline_mode<synchronous>, transform_indices = @transform_4, window_bounds = array<i64: 4, 32, 8>}, {pipeline_mode = #tpu.pipeline_mode<synchronous>, transform_indices = @transform_5, window_bounds = array<i64: 4, 32, 8>}, {pipeline_mode = #tpu.pipeline_mode<synchronous>, transform_indices = @transform_6, window_bounds = array<i64: 4, 8, 32>}, {pipeline_mode = #tpu.pipeline_mode<synchronous>, transform_indices = @transform_7, window_bounds = array<i64: 1, 32>}, {pipeline_mode = #tpu.pipeline_mode<synchronous>, transform_indices = @transform_8, window_bounds = array<i64: 1, 32>}, {transform_indices = @transform_9, window_bounds = array<i64: 1, 8, 32>}]} {
    %c0_i32 = arith.constant 0 : i32
    %0 = arith.cmpi eq, %arg1, %c0_i32 : i32
    %1 = arith.extui %0 : i1 to i32
    %c0_i32_0 = arith.constant 0 : i32
    %2 = arith.cmpi ne, %1, %c0_i32_0 : i32
    scf.if %2 {
      %c0_84 = arith.constant 0 : index
      %c0_85 = arith.constant 0 : index
      %c0_86 = arith.constant 0 : index
      %137 = vector.load %arg3[%c0_84, %c0_85, %c0_86] : memref<1x16x32xf32, #tpu.memory_space<vmem>>, vector<1x16x32xf32>
      %138 = vector.shape_cast %137 : vector<1x16x32xf32> to vector<16x32xf32>
      %139 = arith.truncf %138 : vector<16x32xf32> to vector<16x32xbf16>
      %c0_87 = arith.constant 0 : index
      %c0_88 = arith.constant 0 : index
      %c0_89 = arith.constant 0 : index
      %140 = vector.load %arg4[%c0_87, %c0_88, %c0_89] : memref<1x16x32xf32, #tpu.memory_space<vmem>>, vector<1x16x32xf32>
      %141 = vector.shape_cast %140 : vector<1x16x32xf32> to vector<16x32xf32>
      %142 = arith.truncf %141 : vector<16x32xf32> to vector<16x32xbf16>
      %c0_90 = arith.constant 0 : index
      %c0_91 = arith.constant 0 : index
      %c0_92 = arith.constant 0 : index
      %143 = vector.load %arg6[%c0_90, %c0_91, %c0_92] : memref<4x32x8xbf16, #tpu.memory_space<vmem>>, vector<1x32x8xbf16>
      %144 = vector.shape_cast %143 : vector<1x32x8xbf16> to vector<32x8xbf16>
      %cst_93 = arith.constant dense<0.000000e+00> : vector<16x8xf32>
      %145 = tpu.matmul %139, %144, %cst_93 {dimension_numbers = #tpu.dot_dimension_numbers<[1], [0], [0], [1], [0, 0, 1, 1], [], []>} : vector<16x32xbf16>, vector<32x8xbf16>, vector<16x8xf32> -> vector<16x8xf32>
      %146 = arith.truncf %145 : vector<16x8xf32> to vector<16x8xbf16>
      %c0_94 = arith.constant 0 : index
      %c0_95 = arith.constant 0 : index
      %c0_96 = arith.constant 0 : index
      %147 = vector.load %arg12[%c0_94, %c0_95, %c0_96] : memref<4x16x8xbf16, #tpu.memory_space<vmem>>, vector<1x16x8xbf16>
      %148 = vector.shape_cast %147 : vector<1x16x8xbf16> to vector<16x8xbf16>
      %149 = vector.shape_cast %146 : vector<16x8xbf16> to vector<1x16x8xbf16>
      tpu.vector_store %arg12[%c0_94, %c0_95, %c0_96], %149 {strides = array<i32>} : memref<4x16x8xbf16, #tpu.memory_space<vmem>>, vector<1x16x8xbf16>,
      %c0_97 = arith.constant 0 : index
      %c0_98 = arith.constant 0 : index
      %c0_99 = arith.constant 0 : index
      %150 = vector.load %arg7[%c0_97, %c0_98, %c0_99] : memref<4x32x8xbf16, #tpu.memory_space<vmem>>, vector<1x32x8xbf16>
      %151 = vector.shape_cast %150 : vector<1x32x8xbf16> to vector<32x8xbf16>
      %cst_100 = arith.constant dense<0.000000e+00> : vector<16x8xf32>
      %152 = tpu.matmul %142, %151, %cst_100 {dimension_numbers = #tpu.dot_dimension_numbers<[1], [0], [0], [1], [0, 0, 1, 1], [], []>} : vector<16x32xbf16>, vector<32x8xbf16>, vector<16x8xf32> -> vector<16x8xf32>
      %153 = arith.truncf %152 : vector<16x8xf32> to vector<16x8xbf16>
      %c0_101 = arith.constant 0 : index
      %c0_102 = arith.constant 0 : index
      %c0_103 = arith.constant 0 : index
      %154 = vector.load %arg13[%c0_101, %c0_102, %c0_103] : memref<4x16x8xbf16, #tpu.memory_space<vmem>>, vector<1x16x8xbf16>
      %155 = vector.shape_cast %154 : vector<1x16x8xbf16> to vector<16x8xbf16>
      %156 = vector.shape_cast %153 : vector<16x8xbf16> to vector<1x16x8xbf16>
      tpu.vector_store %arg13[%c0_101, %c0_102, %c0_103], %156 {strides = array<i32>} : memref<4x16x8xbf16, #tpu.memory_space<vmem>>, vector<1x16x8xbf16>,
      %c1_104 = arith.constant 1 : index
      %c0_105 = arith.constant 0 : index
      %c0_106 = arith.constant 0 : index
      %157 = vector.load %arg6[%c1_104, %c0_105, %c0_106] : memref<4x32x8xbf16, #tpu.memory_space<vmem>>, vector<1x32x8xbf16>
      %158 = vector.shape_cast %157 : vector<1x32x8xbf16> to vector<32x8xbf16>
      %cst_107 = arith.constant dense<0.000000e+00> : vector<16x8xf32>
      %159 = tpu.matmul %139, %158, %cst_107 {dimension_numbers = #tpu.dot_dimension_numbers<[1], [0], [0], [1], [0, 0, 1, 1], [], []>} : vector<16x32xbf16>, vector<32x8xbf16>, vector<16x8xf32> -> vector<16x8xf32>
      %160 = arith.truncf %159 : vector<16x8xf32> to vector<16x8xbf16>
      %c1_108 = arith.constant 1 : index
      %c0_109 = arith.constant 0 : index
      %c0_110 = arith.constant 0 : index
      %161 = vector.load %arg12[%c1_108, %c0_109, %c0_110] : memref<4x16x8xbf16, #tpu.memory_space<vmem>>, vector<1x16x8xbf16>
      %162 = vector.shape_cast %161 : vector<1x16x8xbf16> to vector<16x8xbf16>
      %163 = vector.shape_cast %160 : vector<16x8xbf16> to vector<1x16x8xbf16>
      tpu.vector_store %arg12[%c1_108, %c0_109, %c0_110], %163 {strides = array<i32>} : memref<4x16x8xbf16, #tpu.memory_space<vmem>>, vector<1x16x8xbf16>,
      %c1_111 = arith.constant 1 : index
      %c0_112 = arith.constant 0 : index
      %c0_113 = arith.constant 0 : index
      %164 = vector.load %arg7[%c1_111, %c0_112, %c0_113] : memref<4x32x8xbf16, #tpu.memory_space<vmem>>, vector<1x32x8xbf16>
      %165 = vector.shape_cast %164 : vector<1x32x8xbf16> to vector<32x8xbf16>
      %cst_114 = arith.constant dense<0.000000e+00> : vector<16x8xf32>
      %166 = tpu.matmul %142, %165, %cst_114 {dimension_numbers = #tpu.dot_dimension_numbers<[1], [0], [0], [1], [0, 0, 1, 1], [], []>} : vector<16x32xbf16>, vector<32x8xbf16>, vector<16x8xf32> -> vector<16x8xf32>
      %167 = arith.truncf %166 : vector<16x8xf32> to vector<16x8xbf16>
      %c1_115 = arith.constant 1 : index
      %c0_116 = arith.constant 0 : index
      %c0_117 = arith.constant 0 : index
      %168 = vector.load %arg13[%c1_115, %c0_116, %c0_117] : memref<4x16x8xbf16, #tpu.memory_space<vmem>>, vector<1x16x8xbf16>
      %169 = vector.shape_cast %168 : vector<1x16x8xbf16> to vector<16x8xbf16>
      %170 = vector.shape_cast %167 : vector<16x8xbf16> to vector<1x16x8xbf16>
      tpu.vector_store %arg13[%c1_115, %c0_116, %c0_117], %170 {strides = array<i32>} : memref<4x16x8xbf16, #tpu.memory_space<vmem>>, vector<1x16x8xbf16>,
      %c2_118 = arith.constant 2 : index
      %c0_119 = arith.constant 0 : index
      %c0_120 = arith.constant 0 : index
      %171 = vector.load %arg6[%c2_118, %c0_119, %c0_120] : memref<4x32x8xbf16, #tpu.memory_space<vmem>>, vector<1x32x8xbf16>
      %172 = vector.shape_cast %171 : vector<1x32x8xbf16> to vector<32x8xbf16>
      %cst_121 = arith.constant dense<0.000000e+00> : vector<16x8xf32>
      %173 = tpu.matmul %139, %172, %cst_121 {dimension_numbers = #tpu.dot_dimension_numbers<[1], [0], [0], [1], [0, 0, 1, 1], [], []>} : vector<16x32xbf16>, vector<32x8xbf16>, vector<16x8xf32> -> vector<16x8xf32>
      %174 = arith.truncf %173 : vector<16x8xf32> to vector<16x8xbf16>
      %c2_122 = arith.constant 2 : index
      %c0_123 = arith.constant 0 : index
      %c0_124 = arith.constant 0 : index
      %175 = vector.load %arg12[%c2_122, %c0_123, %c0_124] : memref<4x16x8xbf16, #tpu.memory_space<vmem>>, vector<1x16x8xbf16>
      %176 = vector.shape_cast %175 : vector<1x16x8xbf16> to vector<16x8xbf16>
      %177 = vector.shape_cast %174 : vector<16x8xbf16> to vector<1x16x8xbf16>
      tpu.vector_store %arg12[%c2_122, %c0_123, %c0_124], %177 {strides = array<i32>} : memref<4x16x8xbf16, #tpu.memory_space<vmem>>, vector<1x16x8xbf16>,
      %c2_125 = arith.constant 2 : index
      %c0_126 = arith.constant 0 : index
      %c0_127 = arith.constant 0 : index
      %178 = vector.load %arg7[%c2_125, %c0_126, %c0_127] : memref<4x32x8xbf16, #tpu.memory_space<vmem>>, vector<1x32x8xbf16>
      %179 = vector.shape_cast %178 : vector<1x32x8xbf16> to vector<32x8xbf16>
      %cst_128 = arith.constant dense<0.000000e+00> : vector<16x8xf32>
      %180 = tpu.matmul %142, %179, %cst_128 {dimension_numbers = #tpu.dot_dimension_numbers<[1], [0], [0], [1], [0, 0, 1, 1], [], []>} : vector<16x32xbf16>, vector<32x8xbf16>, vector<16x8xf32> -> vector<16x8xf32>
      %181 = arith.truncf %180 : vector<16x8xf32> to vector<16x8xbf16>
      %c2_129 = arith.constant 2 : index
      %c0_130 = arith.constant 0 : index
      %c0_131 = arith.constant 0 : index
      %182 = vector.load %arg13[%c2_129, %c0_130, %c0_131] : memref<4x16x8xbf16, #tpu.memory_space<vmem>>, vector<1x16x8xbf16>
      %183 = vector.shape_cast %182 : vector<1x16x8xbf16> to vector<16x8xbf16>
      %184 = vector.shape_cast %181 : vector<16x8xbf16> to vector<1x16x8xbf16>
      tpu.vector_store %arg13[%c2_129, %c0_130, %c0_131], %184 {strides = array<i32>} : memref<4x16x8xbf16, #tpu.memory_space<vmem>>, vector<1x16x8xbf16>,
      %c3_132 = arith.constant 3 : index
      %c0_133 = arith.constant 0 : index
      %c0_134 = arith.constant 0 : index
      %185 = vector.load %arg6[%c3_132, %c0_133, %c0_134] : memref<4x32x8xbf16, #tpu.memory_space<vmem>>, vector<1x32x8xbf16>
      %186 = vector.shape_cast %185 : vector<1x32x8xbf16> to vector<32x8xbf16>
      %cst_135 = arith.constant dense<0.000000e+00> : vector<16x8xf32>
      %187 = tpu.matmul %139, %186, %cst_135 {dimension_numbers = #tpu.dot_dimension_numbers<[1], [0], [0], [1], [0, 0, 1, 1], [], []>} : vector<16x32xbf16>, vector<32x8xbf16>, vector<16x8xf32> -> vector<16x8xf32>
      %188 = arith.truncf %187 : vector<16x8xf32> to vector<16x8xbf16>
      %c3_136 = arith.constant 3 : index
      %c0_137 = arith.constant 0 : index
      %c0_138 = arith.constant 0 : index
      %189 = vector.load %arg12[%c3_136, %c0_137, %c0_138] : memref<4x16x8xbf16, #tpu.memory_space<vmem>>, vector<1x16x8xbf16>
      %190 = vector.shape_cast %189 : vector<1x16x8xbf16> to vector<16x8xbf16>
      %191 = vector.shape_cast %188 : vector<16x8xbf16> to vector<1x16x8xbf16>
      tpu.vector_store %arg12[%c3_136, %c0_137, %c0_138], %191 {strides = array<i32>} : memref<4x16x8xbf16, #tpu.memory_space<vmem>>, vector<1x16x8xbf16>,
      %c3_139 = arith.constant 3 : index
      %c0_140 = arith.constant 0 : index
      %c0_141 = arith.constant 0 : index
      %192 = vector.load %arg7[%c3_139, %c0_140, %c0_141] : memref<4x32x8xbf16, #tpu.memory_space<vmem>>, vector<1x32x8xbf16>
      %193 = vector.shape_cast %192 : vector<1x32x8xbf16> to vector<32x8xbf16>
      %cst_142 = arith.constant dense<0.000000e+00> : vector<16x8xf32>
      %194 = tpu.matmul %142, %193, %cst_142 {dimension_numbers = #tpu.dot_dimension_numbers<[1], [0], [0], [1], [0, 0, 1, 1], [], []>} : vector<16x32xbf16>, vector<32x8xbf16>, vector<16x8xf32> -> vector<16x8xf32>
      %195 = arith.truncf %194 : vector<16x8xf32> to vector<16x8xbf16>
      %c3_143 = arith.constant 3 : index
      %c0_144 = arith.constant 0 : index
      %c0_145 = arith.constant 0 : index
      %196 = vector.load %arg13[%c3_143, %c0_144, %c0_145] : memref<4x16x8xbf16, #tpu.memory_space<vmem>>, vector<1x16x8xbf16>
      %197 = vector.shape_cast %196 : vector<1x16x8xbf16> to vector<16x8xbf16>
      %198 = vector.shape_cast %195 : vector<16x8xbf16> to vector<1x16x8xbf16>
      tpu.vector_store %arg13[%c3_143, %c0_144, %c0_145], %198 {strides = array<i32>} : memref<4x16x8xbf16, #tpu.memory_space<vmem>>, vector<1x16x8xbf16>,
    } else {
    }
    %c0 = arith.constant 0 : index
    %c0_1 = arith.constant 0 : index
    %c0_2 = arith.constant 0 : index
    %3 = vector.load %arg2[%c0, %c0_1, %c0_2] : memref<1x8x32xf32, #tpu.memory_space<vmem>>, vector<1x8x32xf32>
    %4 = vector.shape_cast %3 : vector<1x8x32xf32> to vector<8x32xf32>
    %5 = arith.truncf %4 : vector<8x32xf32> to vector<8x32xbf16>
    %cst = arith.constant 0.000000e+00 : f32
    %6 = vector.broadcast %cst : f32 to vector<8x32xf32>
    %c0_3 = arith.constant 0 : index
    %c0_4 = arith.constant 0 : index
    %c0_5 = arith.constant 0 : index
    %7 = vector.load %arg5[%c0_3, %c0_4, %c0_5] : memref<4x32x8xbf16, #tpu.memory_space<vmem>>, vector<1x32x8xbf16>
    %8 = vector.shape_cast %7 : vector<1x32x8xbf16> to vector<32x8xbf16>
    %cst_6 = arith.constant dense<0.000000e+00> : vector<8x8xf32>
    %9 = tpu.matmul %5, %8, %cst_6 {dimension_numbers = #tpu.dot_dimension_numbers<[1], [0], [0], [1], [0, 0, 1, 1], [], []>} : vector<8x32xbf16>, vector<32x8xbf16>, vector<8x8xf32> -> vector<8x8xf32>
    %c0_7 = arith.constant 0 : index
    %c0_8 = arith.constant 0 : index
    %c0_9 = arith.constant 0 : index
    %10 = vector.load %arg12[%c0_7, %c0_8, %c0_9] : memref<4x16x8xbf16, #tpu.memory_space<vmem>>, vector<1x16x8xbf16>
    %11 = vector.shape_cast %10 : vector<1x16x8xbf16> to vector<16x8xbf16>
    %c0_10 = arith.constant 0 : index
    %c0_11 = arith.constant 0 : index
    %c0_12 = arith.constant 0 : index
    %12 = vector.load %arg13[%c0_10, %c0_11, %c0_12] : memref<4x16x8xbf16, #tpu.memory_space<vmem>>, vector<1x16x8xbf16>
    %13 = vector.shape_cast %12 : vector<1x16x8xbf16> to vector<16x8xbf16>
    %14 = arith.truncf %9 : vector<8x8xf32> to vector<8x8xbf16>
    %cst_13 = arith.constant dense<0.000000e+00> : vector<8x16xf32>
    %15 = tpu.matmul %14, %11, %cst_13 {dimension_numbers = #tpu.dot_dimension_numbers<[1], [1], [0], [0], [0, 0, 1, 0], [], []>} : vector<8x8xbf16>, vector<16x8xbf16>, vector<8x16xf32> -> vector<8x16xf32>
    %cst_14 = arith.constant dense<0xFF800000> : vector<8xf32>
    %16 = vector.multi_reduction <maximumf>, %15, %cst_14 [1] : vector<8x16xf32> to vector<8xf32>
    %17 = vector.shape_cast %16 : vector<8xf32> to vector<8x1xf32>
    %18 = vector.broadcast %17 : vector<8x1xf32> to vector<8x16xf32>
    %19 = arith.subf %15, %18 : vector<8x16xf32>
    %20 = math.exp %19 : vector<8x16xf32>
    %cst_15 = arith.constant dense<0.000000e+00> : vector<8xf32>
    %21 = vector.multi_reduction <add>, %20, %cst_15 [1] : vector<8x16xf32> to vector<8xf32>
    %22 = vector.shape_cast %21 : vector<8xf32> to vector<8x1xf32>
    %23 = tpu.reciprocal %22 {approx = true} : vector<8x1xf32> -> vector<8x1xf32>
    %24 = vector.broadcast %23 : vector<8x1xf32> to vector<8x16xf32>
    %25 = arith.mulf %20, %24 : vector<8x16xf32>
    %26 = arith.truncf %25 : vector<8x16xf32> to vector<8x16xbf16>
    %cst_16 = arith.constant dense<0.000000e+00> : vector<8x8xf32>
    %27 = tpu.matmul %26, %13, %cst_16 {dimension_numbers = #tpu.dot_dimension_numbers<[1], [0], [0], [1], [0, 0, 1, 1], [], []>} : vector<8x16xbf16>, vector<16x8xbf16>, vector<8x8xf32> -> vector<8x8xf32>
    %28 = arith.truncf %27 : vector<8x8xf32> to vector<8x8xbf16>
    %c0_17 = arith.constant 0 : index
    %c0_18 = arith.constant 0 : index
    %c0_19 = arith.constant 0 : index
    %29 = vector.load %arg8[%c0_17, %c0_18, %c0_19] : memref<4x8x32xbf16, #tpu.memory_space<vmem>>, vector<1x8x32xbf16>
    %30 = vector.shape_cast %29 : vector<1x8x32xbf16> to vector<8x32xbf16>
    %cst_20 = arith.constant dense<0.000000e+00> : vector<8x32xf32>
    %31 = tpu.matmul %28, %30, %cst_20 {dimension_numbers = #tpu.dot_dimension_numbers<[1], [0], [0], [1], [0, 0, 1, 1], [], []>} : vector<8x8xbf16>, vector<8x32xbf16>, vector<8x32xf32> -> vector<8x32xf32>
    %32 = arith.addf %6, %31 : vector<8x32xf32>
    %c1 = arith.constant 1 : index
    %c0_21 = arith.constant 0 : index
    %c0_22 = arith.constant 0 : index
    %33 = vector.load %arg5[%c1, %c0_21, %c0_22] : memref<4x32x8xbf16, #tpu.memory_space<vmem>>, vector<1x32x8xbf16>
    %34 = vector.shape_cast %33 : vector<1x32x8xbf16> to vector<32x8xbf16>
    %cst_23 = arith.constant dense<0.000000e+00> : vector<8x8xf32>
    %35 = tpu.matmul %5, %34, %cst_23 {dimension_numbers = #tpu.dot_dimension_numbers<[1], [0], [0], [1], [0, 0, 1, 1], [], []>} : vector<8x32xbf16>, vector<32x8xbf16>, vector<8x8xf32> -> vector<8x8xf32>
    %c1_24 = arith.constant 1 : index
    %c0_25 = arith.constant 0 : index
    %c0_26 = arith.constant 0 : index
    %36 = vector.load %arg12[%c1_24, %c0_25, %c0_26] : memref<4x16x8xbf16, #tpu.memory_space<vmem>>, vector<1x16x8xbf16>
    %37 = vector.shape_cast %36 : vector<1x16x8xbf16> to vector<16x8xbf16>
    %c1_27 = arith.constant 1 : index
    %c0_28 = arith.constant 0 : index
    %c0_29 = arith.constant 0 : index
    %38 = vector.load %arg13[%c1_27, %c0_28, %c0_29] : memref<4x16x8xbf16, #tpu.memory_space<vmem>>, vector<1x16x8xbf16>
    %39 = vector.shape_cast %38 : vector<1x16x8xbf16> to vector<16x8xbf16>
    %40 = arith.truncf %35 : vector<8x8xf32> to vector<8x8xbf16>
    %cst_30 = arith.constant dense<0.000000e+00> : vector<8x16xf32>
    %41 = tpu.matmul %40, %37, %cst_30 {dimension_numbers = #tpu.dot_dimension_numbers<[1], [1], [0], [0], [0, 0, 1, 0], [], []>} : vector<8x8xbf16>, vector<16x8xbf16>, vector<8x16xf32> -> vector<8x16xf32>
    %cst_31 = arith.constant dense<0xFF800000> : vector<8xf32>
    %42 = vector.multi_reduction <maximumf>, %41, %cst_31 [1] : vector<8x16xf32> to vector<8xf32>
    %43 = vector.shape_cast %42 : vector<8xf32> to vector<8x1xf32>
    %44 = vector.broadcast %43 : vector<8x1xf32> to vector<8x16xf32>
    %45 = arith.subf %41, %44 : vector<8x16xf32>
    %46 = math.exp %45 : vector<8x16xf32>
    %cst_32 = arith.constant dense<0.000000e+00> : vector<8xf32>
    %47 = vector.multi_reduction <add>, %46, %cst_32 [1] : vector<8x16xf32> to vector<8xf32>
    %48 = vector.shape_cast %47 : vector<8xf32> to vector<8x1xf32>
    %49 = tpu.reciprocal %48 {approx = true} : vector<8x1xf32> -> vector<8x1xf32>
    %50 = vector.broadcast %49 : vector<8x1xf32> to vector<8x16xf32>
    %51 = arith.mulf %46, %50 : vector<8x16xf32>
    %52 = arith.truncf %51 : vector<8x16xf32> to vector<8x16xbf16>
    %cst_33 = arith.constant dense<0.000000e+00> : vector<8x8xf32>
    %53 = tpu.matmul %52, %39, %cst_33 {dimension_numbers = #tpu.dot_dimension_numbers<[1], [0], [0], [1], [0, 0, 1, 1], [], []>} : vector<8x16xbf16>, vector<16x8xbf16>, vector<8x8xf32> -> vector<8x8xf32>
    %54 = arith.truncf %53 : vector<8x8xf32> to vector<8x8xbf16>
    %c1_34 = arith.constant 1 : index
    %c0_35 = arith.constant 0 : index
    %c0_36 = arith.constant 0 : index
    %55 = vector.load %arg8[%c1_34, %c0_35, %c0_36] : memref<4x8x32xbf16, #tpu.memory_space<vmem>>, vector<1x8x32xbf16>
    %56 = vector.shape_cast %55 : vector<1x8x32xbf16> to vector<8x32xbf16>
    %cst_37 = arith.constant dense<0.000000e+00> : vector<8x32xf32>
    %57 = tpu.matmul %54, %56, %cst_37 {dimension_numbers = #tpu.dot_dimension_numbers<[1], [0], [0], [1], [0, 0, 1, 1], [], []>} : vector<8x8xbf16>, vector<8x32xbf16>, vector<8x32xf32> -> vector<8x32xf32>
    %58 = arith.addf %32, %57 : vector<8x32xf32>
    %c2 = arith.constant 2 : index
    %c0_38 = arith.constant 0 : index
    %c0_39 = arith.constant 0 : index
    %59 = vector.load %arg5[%c2, %c0_38, %c0_39] : memref<4x32x8xbf16, #tpu.memory_space<vmem>>, vector<1x32x8xbf16>
    %60 = vector.shape_cast %59 : vector<1x32x8xbf16> to vector<32x8xbf16>
    %cst_40 = arith.constant dense<0.000000e+00> : vector<8x8xf32>
    %61 = tpu.matmul %5, %60, %cst_40 {dimension_numbers = #tpu.dot_dimension_numbers<[1], [0], [0], [1], [0, 0, 1, 1], [], []>} : vector<8x32xbf16>, vector<32x8xbf16>, vector<8x8xf32> -> vector<8x8xf32>
    %c2_41 = arith.constant 2 : index
    %c0_42 = arith.constant 0 : index
    %c0_43 = arith.constant 0 : index
    %62 = vector.load %arg12[%c2_41, %c0_42, %c0_43] : memref<4x16x8xbf16, #tpu.memory_space<vmem>>, vector<1x16x8xbf16>
    %63 = vector.shape_cast %62 : vector<1x16x8xbf16> to vector<16x8xbf16>
    %c2_44 = arith.constant 2 : index
    %c0_45 = arith.constant 0 : index
    %c0_46 = arith.constant 0 : index
    %64 = vector.load %arg13[%c2_44, %c0_45, %c0_46] : memref<4x16x8xbf16, #tpu.memory_space<vmem>>, vector<1x16x8xbf16>
    %65 = vector.shape_cast %64 : vector<1x16x8xbf16> to vector<16x8xbf16>
    %66 = arith.truncf %61 : vector<8x8xf32> to vector<8x8xbf16>
    %cst_47 = arith.constant dense<0.000000e+00> : vector<8x16xf32>
    %67 = tpu.matmul %66, %63, %cst_47 {dimension_numbers = #tpu.dot_dimension_numbers<[1], [1], [0], [0], [0, 0, 1, 0], [], []>} : vector<8x8xbf16>, vector<16x8xbf16>, vector<8x16xf32> -> vector<8x16xf32>
    %cst_48 = arith.constant dense<0xFF800000> : vector<8xf32>
    %68 = vector.multi_reduction <maximumf>, %67, %cst_48 [1] : vector<8x16xf32> to vector<8xf32>
    %69 = vector.shape_cast %68 : vector<8xf32> to vector<8x1xf32>
    %70 = vector.broadcast %69 : vector<8x1xf32> to vector<8x16xf32>
    %71 = arith.subf %67, %70 : vector<8x16xf32>
    %72 = math.exp %71 : vector<8x16xf32>
    %cst_49 = arith.constant dense<0.000000e+00> : vector<8xf32>
    %73 = vector.multi_reduction <add>, %72, %cst_49 [1] : vector<8x16xf32> to vector<8xf32>
    %74 = vector.shape_cast %73 : vector<8xf32> to vector<8x1xf32>
    %75 = tpu.reciprocal %74 {approx = true} : vector<8x1xf32> -> vector<8x1xf32>
    %76 = vector.broadcast %75 : vector<8x1xf32> to vector<8x16xf32>
    %77 = arith.mulf %72, %76 : vector<8x16xf32>
    %78 = arith.truncf %77 : vector<8x16xf32> to vector<8x16xbf16>
    %cst_50 = arith.constant dense<0.000000e+00> : vector<8x8xf32>
    %79 = tpu.matmul %78, %65, %cst_50 {dimension_numbers = #tpu.dot_dimension_numbers<[1], [0], [0], [1], [0, 0, 1, 1], [], []>} : vector<8x16xbf16>, vector<16x8xbf16>, vector<8x8xf32> -> vector<8x8xf32>
    %80 = arith.truncf %79 : vector<8x8xf32> to vector<8x8xbf16>
    %c2_51 = arith.constant 2 : index
    %c0_52 = arith.constant 0 : index
    %c0_53 = arith.constant 0 : index
    %81 = vector.load %arg8[%c2_51, %c0_52, %c0_53] : memref<4x8x32xbf16, #tpu.memory_space<vmem>>, vector<1x8x32xbf16>
    %82 = vector.shape_cast %81 : vector<1x8x32xbf16> to vector<8x32xbf16>
    %cst_54 = arith.constant dense<0.000000e+00> : vector<8x32xf32>
    %83 = tpu.matmul %80, %82, %cst_54 {dimension_numbers = #tpu.dot_dimension_numbers<[1], [0], [0], [1], [0, 0, 1, 1], [], []>} : vector<8x8xbf16>, vector<8x32xbf16>, vector<8x32xf32> -> vector<8x32xf32>
    %84 = arith.addf %58, %83 : vector<8x32xf32>
    %c3 = arith.constant 3 : index
    %c0_55 = arith.constant 0 : index
    %c0_56 = arith.constant 0 : index
    %85 = vector.load %arg5[%c3, %c0_55, %c0_56] : memref<4x32x8xbf16, #tpu.memory_space<vmem>>, vector<1x32x8xbf16>
    %86 = vector.shape_cast %85 : vector<1x32x8xbf16> to vector<32x8xbf16>
    %cst_57 = arith.constant dense<0.000000e+00> : vector<8x8xf32>
    %87 = tpu.matmul %5, %86, %cst_57 {dimension_numbers = #tpu.dot_dimension_numbers<[1], [0], [0], [1], [0, 0, 1, 1], [], []>} : vector<8x32xbf16>, vector<32x8xbf16>, vector<8x8xf32> -> vector<8x8xf32>
    %c3_58 = arith.constant 3 : index
    %c0_59 = arith.constant 0 : index
    %c0_60 = arith.constant 0 : index
    %88 = vector.load %arg12[%c3_58, %c0_59, %c0_60] : memref<4x16x8xbf16, #tpu.memory_space<vmem>>, vector<1x16x8xbf16>
    %89 = vector.shape_cast %88 : vector<1x16x8xbf16> to vector<16x8xbf16>
    %c3_61 = arith.constant 3 : index
    %c0_62 = arith.constant 0 : index
    %c0_63 = arith.constant 0 : index
    %90 = vector.load %arg13[%c3_61, %c0_62, %c0_63] : memref<4x16x8xbf16, #tpu.memory_space<vmem>>, vector<1x16x8xbf16>
    %91 = vector.shape_cast %90 : vector<1x16x8xbf16> to vector<16x8xbf16>
    %92 = arith.truncf %87 : vector<8x8xf32> to vector<8x8xbf16>
    %cst_64 = arith.constant dense<0.000000e+00> : vector<8x16xf32>
    %93 = tpu.matmul %92, %89, %cst_64 {dimension_numbers = #tpu.dot_dimension_numbers<[1], [1], [0], [0], [0, 0, 1, 0], [], []>} : vector<8x8xbf16>, vector<16x8xbf16>, vector<8x16xf32> -> vector<8x16xf32>
    %cst_65 = arith.constant dense<0xFF800000> : vector<8xf32>
    %94 = vector.multi_reduction <maximumf>, %93, %cst_65 [1] : vector<8x16xf32> to vector<8xf32>
    %95 = vector.shape_cast %94 : vector<8xf32> to vector<8x1xf32>
    %96 = vector.broadcast %95 : vector<8x1xf32> to vector<8x16xf32>
    %97 = arith.subf %93, %96 : vector<8x16xf32>
    %98 = math.exp %97 : vector<8x16xf32>
    %cst_66 = arith.constant dense<0.000000e+00> : vector<8xf32>
    %99 = vector.multi_reduction <add>, %98, %cst_66 [1] : vector<8x16xf32> to vector<8xf32>
    %100 = vector.shape_cast %99 : vector<8xf32> to vector<8x1xf32>
    %101 = tpu.reciprocal %100 {approx = true} : vector<8x1xf32> -> vector<8x1xf32>
    %102 = vector.broadcast %101 : vector<8x1xf32> to vector<8x16xf32>
    %103 = arith.mulf %98, %102 : vector<8x16xf32>
    %104 = arith.truncf %103 : vector<8x16xf32> to vector<8x16xbf16>
    %cst_67 = arith.constant dense<0.000000e+00> : vector<8x8xf32>
    %105 = tpu.matmul %104, %91, %cst_67 {dimension_numbers = #tpu.dot_dimension_numbers<[1], [0], [0], [1], [0, 0, 1, 1], [], []>} : vector<8x16xbf16>, vector<16x8xbf16>, vector<8x8xf32> -> vector<8x8xf32>
    %106 = arith.truncf %105 : vector<8x8xf32> to vector<8x8xbf16>
    %c3_68 = arith.constant 3 : index
    %c0_69 = arith.constant 0 : index
    %c0_70 = arith.constant 0 : index
    %107 = vector.load %arg8[%c3_68, %c0_69, %c0_70] : memref<4x8x32xbf16, #tpu.memory_space<vmem>>, vector<1x8x32xbf16>
    %108 = vector.shape_cast %107 : vector<1x8x32xbf16> to vector<8x32xbf16>
    %cst_71 = arith.constant dense<0.000000e+00> : vector<8x32xf32>
    %109 = tpu.matmul %106, %108, %cst_71 {dimension_numbers = #tpu.dot_dimension_numbers<[1], [0], [0], [1], [0, 0, 1, 1], [], []>} : vector<8x8xbf16>, vector<8x32xbf16>, vector<8x32xf32> -> vector<8x32xf32>
    %110 = arith.addf %84, %109 : vector<8x32xf32>
    %111 = arith.addf %110, %4 : vector<8x32xf32>
    %cst_72 = arith.constant dense<0.000000e+00> : vector<8xf32>
    %112 = vector.multi_reduction <add>, %111, %cst_72 [1] : vector<8x32xf32> to vector<8xf32>
    %113 = vector.shape_cast %112 : vector<8xf32> to vector<8x1xf32>
    %cst_73 = arith.constant 3.200000e+01 : f32
    %114 = vector.broadcast %cst_73 : f32 to vector<8x1xf32>
    %115 = arith.divf %113, %114 : vector<8x1xf32>
    %116 = vector.broadcast %115 : vector<8x1xf32> to vector<8x32xf32>
    %117 = arith.subf %111, %116 : vector<8x32xf32>
    %118 = arith.mulf %117, %117 : vector<8x32xf32>
    %cst_74 = arith.constant dense<0.000000e+00> : vector<8xf32>
    %119 = vector.multi_reduction <add>, %118, %cst_74 [1] : vector<8x32xf32> to vector<8xf32>
    %120 = vector.shape_cast %119 : vector<8xf32> to vector<8x1xf32>
    %cst_75 = arith.constant 3.200000e+01 : f32
    %121 = vector.broadcast %cst_75 : f32 to vector<8x1xf32>
    %122 = arith.divf %120, %121 : vector<8x1xf32>
    %cst_76 = arith.constant 9.99999993E-9 : f32
    %123 = vector.broadcast %cst_76 : f32 to vector<8x1xf32>
    %124 = arith.addf %122, %123 : vector<8x1xf32>
    %125 = math.rsqrt %124 : vector<8x1xf32>
    %c0_77 = arith.constant 0 : index
    %c0_78 = arith.constant 0 : index
    %126 = vector.load %arg9[%c0_77, %c0_78] : memref<1x32xf32, #tpu.memory_space<vmem>>, vector<1x32xf32>
    %127 = vector.broadcast %125 : vector<8x1xf32> to vector<8x32xf32>
    %128 = vector.broadcast %126 : vector<1x32xf32> to vector<8x32xf32>
    %129 = arith.mulf %127, %128 : vector<8x32xf32>
    %130 = arith.mulf %117, %129 : vector<8x32xf32>
    %c0_79 = arith.constant 0 : index
    %c0_80 = arith.constant 0 : index
    %131 = vector.load %arg10[%c0_79, %c0_80] : memref<1x32xf32, #tpu.memory_space<vmem>>, vector<1x32xf32>
    %132 = vector.broadcast %131 : vector<1x32xf32> to vector<8x32xf32>
    %133 = arith.addf %130, %132 : vector<8x32xf32>
    %c0_81 = arith.constant 0 : index
    %c0_82 = arith.constant 0 : index
    %c0_83 = arith.constant 0 : index
    %134 = vector.load %arg11[%c0_81, %c0_82, %c0_83] : memref<1x8x32xf32, #tpu.memory_space<vmem>>, vector<1x8x32xf32>
    %135 = vector.shape_cast %134 : vector<1x8x32xf32> to vector<8x32xf32>
    %136 = vector.shape_cast %133 : vector<8x32xf32> to vector<1x8x32xf32>
    tpu.vector_store %arg11[%c0_81, %c0_82, %c0_83], %136 {strides = array<i32>} : memref<1x8x32xf32, #tpu.memory_space<vmem>>, vector<1x8x32xf32>,
    return
  }
  func.func @transform_0(%arg0: i32, %arg1: i32) -> (i32, i32, i32) {
    %c0_i32 = arith.constant 0 : i32
    %c0_i32_0 = arith.constant 0 : i32
    return %arg0, %arg1, %c0_i32 : i32, i32, i32
  }
  func.func @transform_1(%arg0: i32, %arg1: i32) -> (i32, i32, i32) {
    %c0_i32 = arith.constant 0 : i32
    %c0_i32_0 = arith.constant 0 : i32
    %c0_i32_1 = arith.constant 0 : i32
    return %arg0, %c0_i32, %c0_i32_0 : i32, i32, i32
  }
  func.func @transform_2(%arg0: i32, %arg1: i32) -> (i32, i32, i32) {
    %c0_i32 = arith.constant 0 : i32
    %c0_i32_0 = arith.constant 0 : i32
    %c0_i32_1 = arith.constant 0 : i32
    return %arg0, %c0_i32, %c0_i32_0 : i32, i32, i32
  }
  func.func @transform_3(%arg0: i32, %arg1: i32) -> (i32, i32, i32) {
    %c0_i32 = arith.constant 0 : i32
    %c0_i32_0 = arith.constant 0 : i32
    %c0_i32_1 = arith.constant 0 : i32
    %c0_i32_2 = arith.constant 0 : i32
    return %c0_i32, %c0_i32_0, %c0_i32_1 : i32, i32, i32
  }
  func.func @transform_4(%arg0: i32, %arg1: i32) -> (i32, i32, i32) {
    %c0_i32 = arith.constant 0 : i32
    %c0_i32_0 = arith.constant 0 : i32
    %c0_i32_1 = arith.constant 0 : i32
    %c0_i32_2 = arith.constant 0 : i32
    return %c0_i32, %c0_i32_0, %c0_i32_1 : i32, i32, i32
  }
  func.func @transform_5(%arg0: i32, %arg1: i32) -> (i32, i32, i32) {
    %c0_i32 = arith.constant 0 : i32
    %c0_i32_0 = arith.constant 0 : i32
    %c0_i32_1 = arith.constant 0 : i32
    %c0_i32_2 = arith.constant 0 : i32
    return %c0_i32, %c0_i32_0, %c0_i32_1 : i32, i32, i32
  }
  func.func @transform_6(%arg0: i32, %arg1: i32) -> (i32, i32, i32) {
    %c0_i32 = arith.constant 0 : i32
    %c0_i32_0 = arith.constant 0 : i32
    %c0_i32_1 = arith.constant 0 : i32
    %c0_i32_2 = arith.constant 0 : i32
    return %c0_i32, %c0_i32_0, %c0_i32_1 : i32, i32, i32
  }
  func.func @transform_7(%arg0: i32, %arg1: i32) -> (i32, i32) {
    %c0_i32 = arith.constant 0 : i32
    %c0_i32_0 = arith.constant 0 : i32
    %c0_i32_1 = arith.constant 0 : i32
    return %c0_i32, %c0_i32_0 : i32, i32
  }
  func.func @transform_8(%arg0: i32, %arg1: i32) -> (i32, i32) {
    %c0_i32 = arith.constant 0 : i32
    %c0_i32_0 = arith.constant 0 : i32
    %c0_i32_1 = arith.constant 0 : i32
    return %c0_i32, %c0_i32_0 : i32, i32
  }
  func.func @transform_9(%arg0: i32, %arg1: i32) -> (i32, i32, i32) {
    %c0_i32 = arith.constant 0 : i32
    %c0_i32_0 = arith.constant 0 : i32
    return %arg0, %arg1, %c0_i32 : i32, i32, i32
  }
}

module attributes {stable_mosaic.version = 11 : i64} {
  func.func @_mha_kernel(%arg0: i32, %arg1: i32, %arg2: memref<1x8x32xf32, #tpu.memory_space<vmem>>, %arg3: memref<1x16x32xf32, #tpu.memory_space<vmem>>, %arg4: memref<1x16x32xf32, #tpu.memory_space<vmem>>, %arg5: memref<4x32x8xbf16, #tpu.memory_space<vmem>>, %arg6: memref<4x32x8xbf16, #tpu.memory_space<vmem>>, %arg7: memref<4x32x8xbf16, #tpu.memory_space<vmem>>, %arg8: memref<4x8x32xbf16, #tpu.memory_space<vmem>>, %arg9: memref<1x32xf32, #tpu.memory_space<vmem>>, %arg10: memref<1x32xf32, #tpu.memory_space<vmem>>, %arg11: memref<1x8x32xf32, #tpu.memory_space<vmem>>, %arg12: memref<4x16x8xbf16, #tpu.memory_space<vmem>>, %arg13: memref<4x16x8xbf16, #tpu.memory_space<vmem>>) attributes {dimension_semantics = [#tpu.dimension_semantics<parallel>, #tpu.dimension_semantics<arbitrary>], iteration_bounds = array<i64: 2, 2>, scalar_prefetch = 0 : i64, scratch_operands = 2 : i64, tpu.core_type = #tpu.core_type<tc>, window_params = [{transform_indices = @transform_0, window_bounds = array<i64: 1, 8, 32>}, {transform_indices = @transform_1, window_bounds = array<i64: 1, 16, 32>}, {transform_indices = @transform_2, window_bounds = array<i64: 1, 16, 32>}, {pipeline_mode = #tpu.pipeline_mode<synchronous>, transform_indices = @transform_3, window_bounds = array<i64: 4, 32, 8>}, {pipeline_mode = #tpu.pipeline_mode<synchronous>, transform_indices = @transform_4, window_bounds = array<i64: 4, 32, 8>}, {pipeline_mode = #tpu.pipeline_mode<synchronous>, transform_indices = @transform_5, window_bounds = array<i64: 4, 32, 8>}, {pipeline_mode = #tpu.pipeline_mode<synchronous>, transform_indices = @transform_6, window_bounds = array<i64: 4, 8, 32>}, {pipeline_mode = #tpu.pipeline_mode<synchronous>, transform_indices = @transform_7, window_bounds = array<i64: 1, 32>}, {pipeline_mode = #tpu.pipeline_mode<synchronous>, transform_indices = @transform_8, window_bounds = array<i64: 1, 32>}, {transform_indices = @transform_9, window_bounds = array<i64: 1, 8, 32>}]} {
    %c0_i32 = arith.constant 0 : i32
    %0 = arith.cmpi eq, %arg1, %c0_i32 : i32
    %1 = arith.extui %0 : i1 to i32
    %c0_i32_0 = arith.constant 0 : i32
    %2 = arith.cmpi ne, %1, %c0_i32_0 : i32
    scf.if %2 {
      %c0_84 = arith.constant 0 : index
      %c0_85 = arith.constant 0 : index
      %c0_86 = arith.constant 0 : index
      %137 = vector.load %arg3[%c0_84, %c0_85, %c0_86] : memref<1x16x32xf32, #tpu.memory_space<vmem>>, vector<1x16x32xf32>
      %138 = vector.shape_cast %137 : vector<1x16x32xf32> to vector<16x32xf32>
      %139 = arith.truncf %138 : vector<16x32xf32> to vector<16x32xbf16>
      %c0_87 = arith.constant 0 : index
      %c0_88 = arith.constant 0 : index
      %c0_89 = arith.constant 0 : index
      %140 = vector.load %arg4[%c0_87, %c0_88, %c0_89] : memref<1x16x32xf32, #tpu.memory_space<vmem>>, vector<1x16x32xf32>
      %141 = vector.shape_cast %140 : vector<1x16x32xf32> to vector<16x32xf32>
      %142 = arith.truncf %141 : vector<16x32xf32> to vector<16x32xbf16>
      %c0_90 = arith.constant 0 : index
      %c0_91 = arith.constant 0 : index
      %c0_92 = arith.constant 0 : index
      %143 = vector.load %arg6[%c0_90, %c0_91, %c0_92] : memref<4x32x8xbf16, #tpu.memory_space<vmem>>, vector<1x32x8xbf16>
      %144 = vector.shape_cast %143 : vector<1x32x8xbf16> to vector<32x8xbf16>
      %cst_93 = arith.constant dense<0.000000e+00> : vector<16x8xf32>
      %145 = tpu.matmul %139, %144, %cst_93 {dimension_numbers = #tpu.dot_dimension_numbers<[1], [0], [0], [1], [0, 0, 1, 1], [], []>} : vector<16x32xbf16>, vector<32x8xbf16>, vector<16x8xf32> -> vector<16x8xf32>
      %146 = arith.truncf %145 : vector<16x8xf32> to vector<16x8xbf16>
      %c0_94 = arith.constant 0 : index
      %c0_95 = arith.constant 0 : index
      %c0_96 = arith.constant 0 : index
      %147 = vector.load %arg12[%c0_94, %c0_95, %c0_96] : memref<4x16x8xbf16, #tpu.memory_space<vmem>>, vector<1x16x8xbf16>
      %148 = vector.shape_cast %147 : vector<1x16x8xbf16> to vector<16x8xbf16>
      %149 = vector.shape_cast %146 : vector<16x8xbf16> to vector<1x16x8xbf16>
      tpu.vector_store %arg12[%c0_94, %c0_95, %c0_96], %149 {strides = array<i32>} : memref<4x16x8xbf16, #tpu.memory_space<vmem>>, vector<1x16x8xbf16>,
      %c0_97 = arith.constant 0 : index
      %c0_98 = arith.constant 0 : index
      %c0_99 = arith.constant 0 : index
      %150 = vector.load %arg7[%c0_97, %c0_98, %c0_99] : memref<4x32x8xbf16, #tpu.memory_space<vmem>>, vector<1x32x8xbf16>
      %151 = vector.shape_cast %150 : vector<1x32x8xbf16> to vector<32x8xbf16>
      %cst_100 = arith.constant dense<0.000000e+00> : vector<16x8xf32>
      %152 = tpu.matmul %142, %151, %cst_100 {dimension_numbers = #tpu.dot_dimension_numbers<[1], [0], [0], [1], [0, 0, 1, 1], [], []>} : vector<16x32xbf16>, vector<32x8xbf16>, vector<16x8xf32> -> vector<16x8xf32>
      %153 = arith.truncf %152 : vector<16x8xf32> to vector<16x8xbf16>
      %c0_101 = arith.constant 0 : index
      %c0_102 = arith.constant 0 : index
      %c0_103 = arith.constant 0 : index
      %154 = vector.load %arg13[%c0_101, %c0_102, %c0_103] : memref<4x16x8xbf16, #tpu.memory_space<vmem>>, vector<1x16x8xbf16>
      %155 = vector.shape_cast %154 : vector<1x16x8xbf16> to vector<16x8xbf16>
      %156 = vector.shape_cast %153 : vector<16x8xbf16> to vector<1x16x8xbf16>
      tpu.vector_store %arg13[%c0_101, %c0_102, %c0_103], %156 {strides = array<i32>} : memref<4x16x8xbf16, #tpu.memory_space<vmem>>, vector<1x16x8xbf16>,
      %c1_104 = arith.constant 1 : index
      %c0_105 = arith.constant 0 : index
      %c0_106 = arith.constant 0 : index
      %157 = vector.load %arg6[%c1_104, %c0_105, %c0_106] : memref<4x32x8xbf16, #tpu.memory_space<vmem>>, vector<1x32x8xbf16>
      %158 = vector.shape_cast %157 : vector<1x32x8xbf16> to vector<32x8xbf16>
      %cst_107 = arith.constant dense<0.000000e+00> : vector<16x8xf32>
      %159 = tpu.matmul %139, %158, %cst_107 {dimension_numbers = #tpu.dot_dimension_numbers<[1], [0], [0], [1], [0, 0, 1, 1], [], []>} : vector<16x32xbf16>, vector<32x8xbf16>, vector<16x8xf32> -> vector<16x8xf32>
      %160 = arith.truncf %159 : vector<16x8xf32> to vector<16x8xbf16>
      %c1_108 = arith.constant 1 : index
      %c0_109 = arith.constant 0 : index
      %c0_110 = arith.constant 0 : index
      %161 = vector.load %arg12[%c1_108, %c0_109, %c0_110] : memref<4x16x8xbf16, #tpu.memory_space<vmem>>, vector<1x16x8xbf16>
      %162 = vector.shape_cast %161 : vector<1x16x8xbf16> to vector<16x8xbf16>
      %163 = vector.shape_cast %160 : vector<16x8xbf16> to vector<1x16x8xbf16>
      tpu.vector_store %arg12[%c1_108, %c0_109, %c0_110], %163 {strides = array<i32>} : memref<4x16x8xbf16, #tpu.memory_space<vmem>>, vector<1x16x8xbf16>,
      %c1_111 = arith.constant 1 : index
      %c0_112 = arith.constant 0 : index
      %c0_113 = arith.constant 0 : index
      %164 = vector.load %arg7[%c1_111, %c0_112, %c0_113] : memref<4x32x8xbf16, #tpu.memory_space<vmem>>, vector<1x32x8xbf16>
      %165 = vector.shape_cast %164 : vector<1x32x8xbf16> to vector<32x8xbf16>
      %cst_114 = arith.constant dense<0.000000e+00> : vector<16x8xf32>
      %166 = tpu.matmul %142, %165, %cst_114 {dimension_numbers = #tpu.dot_dimension_numbers<[1], [0], [0], [1], [0, 0, 1, 1], [], []>} : vector<16x32xbf16>, vector<32x8xbf16>, vector<16x8xf32> -> vector<16x8xf32>
      %167 = arith.truncf %166 : vector<16x8xf32> to vector<16x8xbf16>
      %c1_115 = arith.constant 1 : index
      %c0_116 = arith.constant 0 : index
      %c0_117 = arith.constant 0 : index
      %168 = vector.load %arg13[%c1_115, %c0_116, %c0_117] : memref<4x16x8xbf16, #tpu.memory_space<vmem>>, vector<1x16x8xbf16>
      %169 = vector.shape_cast %168 : vector<1x16x8xbf16> to vector<16x8xbf16>
      %170 = vector.shape_cast %167 : vector<16x8xbf16> to vector<1x16x8xbf16>
      tpu.vector_store %arg13[%c1_115, %c0_116, %c0_117], %170 {strides = array<i32>} : memref<4x16x8xbf16, #tpu.memory_space<vmem>>, vector<1x16x8xbf16>,
      %c2_118 = arith.constant 2 : index
      %c0_119 = arith.constant 0 : index
      %c0_120 = arith.constant 0 : index
      %171 = vector.load %arg6[%c2_118, %c0_119, %c0_120] : memref<4x32x8xbf16, #tpu.memory_space<vmem>>, vector<1x32x8xbf16>
      %172 = vector.shape_cast %171 : vector<1x32x8xbf16> to vector<32x8xbf16>
      %cst_121 = arith.constant dense<0.000000e+00> : vector<16x8xf32>
      %173 = tpu.matmul %139, %172, %cst_121 {dimension_numbers = #tpu.dot_dimension_numbers<[1], [0], [0], [1], [0, 0, 1, 1], [], []>} : vector<16x32xbf16>, vector<32x8xbf16>, vector<16x8xf32> -> vector<16x8xf32>
      %174 = arith.truncf %173 : vector<16x8xf32> to vector<16x8xbf16>
      %c2_122 = arith.constant 2 : index
      %c0_123 = arith.constant 0 : index
      %c0_124 = arith.constant 0 : index
      %175 = vector.load %arg12[%c2_122, %c0_123, %c0_124] : memref<4x16x8xbf16, #tpu.memory_space<vmem>>, vector<1x16x8xbf16>
      %176 = vector.shape_cast %175 : vector<1x16x8xbf16> to vector<16x8xbf16>
      %177 = vector.shape_cast %174 : vector<16x8xbf16> to vector<1x16x8xbf16>
      tpu.vector_store %arg12[%c2_122, %c0_123, %c0_124], %177 {strides = array<i32>} : memref<4x16x8xbf16, #tpu.memory_space<vmem>>, vector<1x16x8xbf16>,
      %c2_125 = arith.constant 2 : index
      %c0_126 = arith.constant 0 : index
      %c0_127 = arith.constant 0 : index
      %178 = vector.load %arg7[%c2_125, %c0_126, %c0_127] : memref<4x32x8xbf16, #tpu.memory_space<vmem>>, vector<1x32x8xbf16>
      %179 = vector.shape_cast %178 : vector<1x32x8xbf16> to vector<32x8xbf16>
      %cst_128 = arith.constant dense<0.000000e+00> : vector<16x8xf32>
      %180 = tpu.matmul %142, %179, %cst_128 {dimension_numbers = #tpu.dot_dimension_numbers<[1], [0], [0], [1], [0, 0, 1, 1], [], []>} : vector<16x32xbf16>, vector<32x8xbf16>, vector<16x8xf32> -> vector<16x8xf32>
      %181 = arith.truncf %180 : vector<16x8xf32> to vector<16x8xbf16>
      %c2_129 = arith.constant 2 : index
      %c0_130 = arith.constant 0 : index
      %c0_131 = arith.constant 0 : index
      %182 = vector.load %arg13[%c2_129, %c0_130, %c0_131] : memref<4x16x8xbf16, #tpu.memory_space<vmem>>, vector<1x16x8xbf16>
      %183 = vector.shape_cast %182 : vector<1x16x8xbf16> to vector<16x8xbf16>
      %184 = vector.shape_cast %181 : vector<16x8xbf16> to vector<1x16x8xbf16>
      tpu.vector_store %arg13[%c2_129, %c0_130, %c0_131], %184 {strides = array<i32>} : memref<4x16x8xbf16, #tpu.memory_space<vmem>>, vector<1x16x8xbf16>,
      %c3_132 = arith.constant 3 : index
      %c0_133 = arith.constant 0 : index
      %c0_134 = arith.constant 0 : index
      %185 = vector.load %arg6[%c3_132, %c0_133, %c0_134] : memref<4x32x8xbf16, #tpu.memory_space<vmem>>, vector<1x32x8xbf16>
      %186 = vector.shape_cast %185 : vector<1x32x8xbf16> to vector<32x8xbf16>
      %cst_135 = arith.constant dense<0.000000e+00> : vector<16x8xf32>
      %187 = tpu.matmul %139, %186, %cst_135 {dimension_numbers = #tpu.dot_dimension_numbers<[1], [0], [0], [1], [0, 0, 1, 1], [], []>} : vector<16x32xbf16>, vector<32x8xbf16>, vector<16x8xf32> -> vector<16x8xf32>
      %188 = arith.truncf %187 : vector<16x8xf32> to vector<16x8xbf16>
      %c3_136 = arith.constant 3 : index
      %c0_137 = arith.constant 0 : index
      %c0_138 = arith.constant 0 : index
      %189 = vector.load %arg12[%c3_136, %c0_137, %c0_138] : memref<4x16x8xbf16, #tpu.memory_space<vmem>>, vector<1x16x8xbf16>
      %190 = vector.shape_cast %189 : vector<1x16x8xbf16> to vector<16x8xbf16>
      %191 = vector.shape_cast %188 : vector<16x8xbf16> to vector<1x16x8xbf16>
      tpu.vector_store %arg12[%c3_136, %c0_137, %c0_138], %191 {strides = array<i32>} : memref<4x16x8xbf16, #tpu.memory_space<vmem>>, vector<1x16x8xbf16>,
      %c3_139 = arith.constant 3 : index
      %c0_140 = arith.constant 0 : index
      %c0_141 = arith.constant 0 : index
      %192 = vector.load %arg7[%c3_139, %c0_140, %c0_141] : memref<4x32x8xbf16, #tpu.memory_space<vmem>>, vector<1x32x8xbf16>
      %193 = vector.shape_cast %192 : vector<1x32x8xbf16> to vector<32x8xbf16>
      %cst_142 = arith.constant dense<0.000000e+00> : vector<16x8xf32>
      %194 = tpu.matmul %142, %193, %cst_142 {dimension_numbers = #tpu.dot_dimension_numbers<[1], [0], [0], [1], [0, 0, 1, 1], [], []>} : vector<16x32xbf16>, vector<32x8xbf16>, vector<16x8xf32> -> vector<16x8xf32>
      %195 = arith.truncf %194 : vector<16x8xf32> to vector<16x8xbf16>
      %c3_143 = arith.constant 3 : index
      %c0_144 = arith.constant 0 : index
      %c0_145 = arith.constant 0 : index
      %196 = vector.load %arg13[%c3_143, %c0_144, %c0_145] : memref<4x16x8xbf16, #tpu.memory_space<vmem>>, vector<1x16x8xbf16>
      %197 = vector.shape_cast %196 : vector<1x16x8xbf16> to vector<16x8xbf16>
      %198 = vector.shape_cast %195 : vector<16x8xbf16> to vector<1x16x8xbf16>
      tpu.vector_store %arg13[%c3_143, %c0_144, %c0_145], %198 {strides = array<i32>} : memref<4x16x8xbf16, #tpu.memory_space<vmem>>, vector<1x16x8xbf16>,
    } else {
    }
    %c0 = arith.constant 0 : index
    %c0_1 = arith.constant 0 : index
    %c0_2 = arith.constant 0 : index
    %3 = vector.load %arg2[%c0, %c0_1, %c0_2] : memref<1x8x32xf32, #tpu.memory_space<vmem>>, vector<1x8x32xf32>
    %4 = vector.shape_cast %3 : vector<1x8x32xf32> to vector<8x32xf32>
    %5 = arith.truncf %4 : vector<8x32xf32> to vector<8x32xbf16>
    %cst = arith.constant 0.000000e+00 : f32
    %6 = vector.broadcast %cst : f32 to vector<8x32xf32>
    %c0_3 = arith.constant 0 : index
    %c0_4 = arith.constant 0 : index
    %c0_5 = arith.constant 0 : index
    %7 = vector.load %arg5[%c0_3, %c0_4, %c0_5] : memref<4x32x8xbf16, #tpu.memory_space<vmem>>, vector<1x32x8xbf16>
    %8 = vector.shape_cast %7 : vector<1x32x8xbf16> to vector<32x8xbf16>
    %cst_6 = arith.constant dense<0.000000e+00> : vector<8x8xf32>
    %9 = tpu.matmul %5, %8, %cst_6 {dimension_numbers = #tpu.dot_dimension_numbers<[1], [0], [0], [1], [0, 0, 1, 1], [], []>} : vector<8x32xbf16>, vector<32x8xbf16>, vector<8x8xf32> -> vector<8x8xf32>
    %c0_7 = arith.constant 0 : index
    %c0_8 = arith.constant 0 : index
    %c0_9 = arith.constant 0 : index
    %10 = vector.load %arg12[%c0_7, %c0_8, %c0_9] : memref<4x16x8xbf16, #tpu.memory_space<vmem>>, vector<1x16x8xbf16>
    %11 = vector.shape_cast %10 : vector<1x16x8xbf16> to vector<16x8xbf16>
    %c0_10 = arith.constant 0 : index
    %c0_11 = arith.constant 0 : index
    %c0_12 = arith.constant 0 : index
    %12 = vector.load %arg13[%c0_10, %c0_11, %c0_12] : memref<4x16x8xbf16, #tpu.memory_space<vmem>>, vector<1x16x8xbf16>
    %13 = vector.shape_cast %12 : vector<1x16x8xbf16> to vector<16x8xbf16>
    %14 = arith.truncf %9 : vector<8x8xf32> to vector<8x8xbf16>
    %cst_13 = arith.constant dense<0.000000e+00> : vector<8x16xf32>
    %15 = tpu.matmul %14, %11, %cst_13 {dimension_numbers = #tpu.dot_dimension_numbers<[1], [1], [0], [0], [0, 0, 1, 0], [], []>} : vector<8x8xbf16>, vector<16x8xbf16>, vector<8x16xf32> -> vector<8x16xf32>
    %cst_14 = arith.constant dense<0xFF800000> : vector<8xf32>
    %16 = vector.multi_reduction <maximumf>, %15, %cst_14 [1] : vector<8x16xf32> to vector<8xf32>
    %17 = vector.shape_cast %16 : vector<8xf32> to vector<8x1xf32>
    %18 = vector.broadcast %17 : vector<8x1xf32> to vector<8x16xf32>
    %19 = arith.subf %15, %18 : vector<8x16xf32>
    %20 = math.exp %19 : vector<8x16xf32>
    %cst_15 = arith.constant dense<0.000000e+00> : vector<8xf32>
    %21 = vector.multi_reduction <add>, %20, %cst_15 [1] : vector<8x16xf32> to vector<8xf32>
    %22 = vector.shape_cast %21 : vector<8xf32> to vector<8x1xf32>
    %23 = tpu.reciprocal %22 {approx = true} : vector<8x1xf32> -> vector<8x1xf32>
    %24 = vector.broadcast %23 : vector<8x1xf32> to vector<8x16xf32>
    %25 = arith.mulf %20, %24 : vector<8x16xf32>
    %26 = arith.truncf %25 : vector<8x16xf32> to vector<8x16xbf16>
    %cst_16 = arith.constant dense<0.000000e+00> : vector<8x8xf32>
    %27 = tpu.matmul %26, %13, %cst_16 {dimension_numbers = #tpu.dot_dimension_numbers<[1], [0], [0], [1], [0, 0, 1, 1], [], []>} : vector<8x16xbf16>, vector<16x8xbf16>, vector<8x8xf32> -> vector<8x8xf32>
    %28 = arith.truncf %27 : vector<8x8xf32> to vector<8x8xbf16>
    %c0_17 = arith.constant 0 : index
    %c0_18 = arith.constant 0 : index
    %c0_19 = arith.constant 0 : index
    %29 = vector.load %arg8[%c0_17, %c0_18, %c0_19] : memref<4x8x32xbf16, #tpu.memory_space<vmem>>, vector<1x8x32xbf16>
    %30 = vector.shape_cast %29 : vector<1x8x32xbf16> to vector<8x32xbf16>
    %cst_20 = arith.constant dense<0.000000e+00> : vector<8x32xf32>
    %31 = tpu.matmul %28, %30, %cst_20 {dimension_numbers = #tpu.dot_dimension_numbers<[1], [0], [0], [1], [0, 0, 1, 1], [], []>} : vector<8x8xbf16>, vector<8x32xbf16>, vector<8x32xf32> -> vector<8x32xf32>
    %32 = arith.addf %6, %31 : vector<8x32xf32>
    %c1 = arith.constant 1 : index
    %c0_21 = arith.constant 0 : index
    %c0_22 = arith.constant 0 : index
    %33 = vector.load %arg5[%c1, %c0_21, %c0_22] : memref<4x32x8xbf16, #tpu.memory_space<vmem>>, vector<1x32x8xbf16>
    %34 = vector.shape_cast %33 : vector<1x32x8xbf16> to vector<32x8xbf16>
    %cst_23 = arith.constant dense<0.000000e+00> : vector<8x8xf32>
    %35 = tpu.matmul %5, %34, %cst_23 {dimension_numbers = #tpu.dot_dimension_numbers<[1], [0], [0], [1], [0, 0, 1, 1], [], []>} : vector<8x32xbf16>, vector<32x8xbf16>, vector<8x8xf32> -> vector<8x8xf32>
    %c1_24 = arith.constant 1 : index
    %c0_25 = arith.constant 0 : index
    %c0_26 = arith.constant 0 : index
    %36 = vector.load %arg12[%c1_24, %c0_25, %c0_26] : memref<4x16x8xbf16, #tpu.memory_space<vmem>>, vector<1x16x8xbf16>
    %37 = vector.shape_cast %36 : vector<1x16x8xbf16> to vector<16x8xbf16>
    %c1_27 = arith.constant 1 : index
    %c0_28 = arith.constant 0 : index
    %c0_29 = arith.constant 0 : index
    %38 = vector.load %arg13[%c1_27, %c0_28, %c0_29] : memref<4x16x8xbf16, #tpu.memory_space<vmem>>, vector<1x16x8xbf16>
    %39 = vector.shape_cast %38 : vector<1x16x8xbf16> to vector<16x8xbf16>
    %40 = arith.truncf %35 : vector<8x8xf32> to vector<8x8xbf16>
    %cst_30 = arith.constant dense<0.000000e+00> : vector<8x16xf32>
    %41 = tpu.matmul %40, %37, %cst_30 {dimension_numbers = #tpu.dot_dimension_numbers<[1], [1], [0], [0], [0, 0, 1, 0], [], []>} : vector<8x8xbf16>, vector<16x8xbf16>, vector<8x16xf32> -> vector<8x16xf32>
    %cst_31 = arith.constant dense<0xFF800000> : vector<8xf32>
    %42 = vector.multi_reduction <maximumf>, %41, %cst_31 [1] : vector<8x16xf32> to vector<8xf32>
    %43 = vector.shape_cast %42 : vector<8xf32> to vector<8x1xf32>
    %44 = vector.broadcast %43 : vector<8x1xf32> to vector<8x16xf32>
    %45 = arith.subf %41, %44 : vector<8x16xf32>
    %46 = math.exp %45 : vector<8x16xf32>
    %cst_32 = arith.constant dense<0.000000e+00> : vector<8xf32>
    %47 = vector.multi_reduction <add>, %46, %cst_32 [1] : vector<8x16xf32> to vector<8xf32>
    %48 = vector.shape_cast %47 : vector<8xf32> to vector<8x1xf32>
    %49 = tpu.reciprocal %48 {approx = true} : vector<8x1xf32> -> vector<8x1xf32>
    %50 = vector.broadcast %49 : vector<8x1xf32> to vector<8x16xf32>
    %51 = arith.mulf %46, %50 : vector<8x16xf32>
    %52 = arith.truncf %51 : vector<8x16xf32> to vector<8x16xbf16>
    %cst_33 = arith.constant dense<0.000000e+00> : vector<8x8xf32>
    %53 = tpu.matmul %52, %39, %cst_33 {dimension_numbers = #tpu.dot_dimension_numbers<[1], [0], [0], [1], [0, 0, 1, 1], [], []>} : vector<8x16xbf16>, vector<16x8xbf16>, vector<8x8xf32> -> vector<8x8xf32>
    %54 = arith.truncf %53 : vector<8x8xf32> to vector<8x8xbf16>
    %c1_34 = arith.constant 1 : index
    %c0_35 = arith.constant 0 : index
    %c0_36 = arith.constant 0 : index
    %55 = vector.load %arg8[%c1_34, %c0_35, %c0_36] : memref<4x8x32xbf16, #tpu.memory_space<vmem>>, vector<1x8x32xbf16>
    %56 = vector.shape_cast %55 : vector<1x8x32xbf16> to vector<8x32xbf16>
    %cst_37 = arith.constant dense<0.000000e+00> : vector<8x32xf32>
    %57 = tpu.matmul %54, %56, %cst_37 {dimension_numbers = #tpu.dot_dimension_numbers<[1], [0], [0], [1], [0, 0, 1, 1], [], []>} : vector<8x8xbf16>, vector<8x32xbf16>, vector<8x32xf32> -> vector<8x32xf32>
    %58 = arith.addf %32, %57 : vector<8x32xf32>
    %c2 = arith.constant 2 : index
    %c0_38 = arith.constant 0 : index
    %c0_39 = arith.constant 0 : index
    %59 = vector.load %arg5[%c2, %c0_38, %c0_39] : memref<4x32x8xbf16, #tpu.memory_space<vmem>>, vector<1x32x8xbf16>
    %60 = vector.shape_cast %59 : vector<1x32x8xbf16> to vector<32x8xbf16>
    %cst_40 = arith.constant dense<0.000000e+00> : vector<8x8xf32>
    %61 = tpu.matmul %5, %60, %cst_40 {dimension_numbers = #tpu.dot_dimension_numbers<[1], [0], [0], [1], [0, 0, 1, 1], [], []>} : vector<8x32xbf16>, vector<32x8xbf16>, vector<8x8xf32> -> vector<8x8xf32>
    %c2_41 = arith.constant 2 : index
    %c0_42 = arith.constant 0 : index
    %c0_43 = arith.constant 0 : index
    %62 = vector.load %arg12[%c2_41, %c0_42, %c0_43] : memref<4x16x8xbf16, #tpu.memory_space<vmem>>, vector<1x16x8xbf16>
    %63 = vector.shape_cast %62 : vector<1x16x8xbf16> to vector<16x8xbf16>
    %c2_44 = arith.constant 2 : index
    %c0_45 = arith.constant 0 : index
    %c0_46 = arith.constant 0 : index
    %64 = vector.load %arg13[%c2_44, %c0_45, %c0_46] : memref<4x16x8xbf16, #tpu.memory_space<vmem>>, vector<1x16x8xbf16>
    %65 = vector.shape_cast %64 : vector<1x16x8xbf16> to vector<16x8xbf16>
    %66 = arith.truncf %61 : vector<8x8xf32> to vector<8x8xbf16>
    %cst_47 = arith.constant dense<0.000000e+00> : vector<8x16xf32>
    %67 = tpu.matmul %66, %63, %cst_47 {dimension_numbers = #tpu.dot_dimension_numbers<[1], [1], [0], [0], [0, 0, 1, 0], [], []>} : vector<8x8xbf16>, vector<16x8xbf16>, vector<8x16xf32> -> vector<8x16xf32>
    %cst_48 = arith.constant dense<0xFF800000> : vector<8xf32>
    %68 = vector.multi_reduction <maximumf>, %67, %cst_48 [1] : vector<8x16xf32> to vector<8xf32>
    %69 = vector.shape_cast %68 : vector<8xf32> to vector<8x1xf32>
    %70 = vector.broadcast %69 : vector<8x1xf32> to vector<8x16xf32>
    %71 = arith.subf %67, %70 : vector<8x16xf32>
    %72 = math.exp %71 : vector<8x16xf32>
    %cst_49 = arith.constant dense<0.000000e+00> : vector<8xf32>
    %73 = vector.multi_reduction <add>, %72, %cst_49 [1] : vector<8x16xf32> to vector<8xf32>
    %74 = vector.shape_cast %73 : vector<8xf32> to vector<8x1xf32>
    %75 = tpu.reciprocal %74 {approx = true} : vector<8x1xf32> -> vector<8x1xf32>
    %76 = vector.broadcast %75 : vector<8x1xf32> to vector<8x16xf32>
    %77 = arith.mulf %72, %76 : vector<8x16xf32>
    %78 = arith.truncf %77 : vector<8x16xf32> to vector<8x16xbf16>
    %cst_50 = arith.constant dense<0.000000e+00> : vector<8x8xf32>
    %79 = tpu.matmul %78, %65, %cst_50 {dimension_numbers = #tpu.dot_dimension_numbers<[1], [0], [0], [1], [0, 0, 1, 1], [], []>} : vector<8x16xbf16>, vector<16x8xbf16>, vector<8x8xf32> -> vector<8x8xf32>
    %80 = arith.truncf %79 : vector<8x8xf32> to vector<8x8xbf16>
    %c2_51 = arith.constant 2 : index
    %c0_52 = arith.constant 0 : index
    %c0_53 = arith.constant 0 : index
    %81 = vector.load %arg8[%c2_51, %c0_52, %c0_53] : memref<4x8x32xbf16, #tpu.memory_space<vmem>>, vector<1x8x32xbf16>
    %82 = vector.shape_cast %81 : vector<1x8x32xbf16> to vector<8x32xbf16>
    %cst_54 = arith.constant dense<0.000000e+00> : vector<8x32xf32>
    %83 = tpu.matmul %80, %82, %cst_54 {dimension_numbers = #tpu.dot_dimension_numbers<[1], [0], [0], [1], [0, 0, 1, 1], [], []>} : vector<8x8xbf16>, vector<8x32xbf16>, vector<8x32xf32> -> vector<8x32xf32>
    %84 = arith.addf %58, %83 : vector<8x32xf32>
    %c3 = arith.constant 3 : index
    %c0_55 = arith.constant 0 : index
    %c0_56 = arith.constant 0 : index
    %85 = vector.load %arg5[%c3, %c0_55, %c0_56] : memref<4x32x8xbf16, #tpu.memory_space<vmem>>, vector<1x32x8xbf16>
    %86 = vector.shape_cast %85 : vector<1x32x8xbf16> to vector<32x8xbf16>
    %cst_57 = arith.constant dense<0.000000e+00> : vector<8x8xf32>
    %87 = tpu.matmul %5, %86, %cst_57 {dimension_numbers = #tpu.dot_dimension_numbers<[1], [0], [0], [1], [0, 0, 1, 1], [], []>} : vector<8x32xbf16>, vector<32x8xbf16>, vector<8x8xf32> -> vector<8x8xf32>
    %c3_58 = arith.constant 3 : index
    %c0_59 = arith.constant 0 : index
    %c0_60 = arith.constant 0 : index
    %88 = vector.load %arg12[%c3_58, %c0_59, %c0_60] : memref<4x16x8xbf16, #tpu.memory_space<vmem>>, vector<1x16x8xbf16>
    %89 = vector.shape_cast %88 : vector<1x16x8xbf16> to vector<16x8xbf16>
    %c3_61 = arith.constant 3 : index
    %c0_62 = arith.constant 0 : index
    %c0_63 = arith.constant 0 : index
    %90 = vector.load %arg13[%c3_61, %c0_62, %c0_63] : memref<4x16x8xbf16, #tpu.memory_space<vmem>>, vector<1x16x8xbf16>
    %91 = vector.shape_cast %90 : vector<1x16x8xbf16> to vector<16x8xbf16>
    %92 = arith.truncf %87 : vector<8x8xf32> to vector<8x8xbf16>
    %cst_64 = arith.constant dense<0.000000e+00> : vector<8x16xf32>
    %93 = tpu.matmul %92, %89, %cst_64 {dimension_numbers = #tpu.dot_dimension_numbers<[1], [1], [0], [0], [0, 0, 1, 0], [], []>} : vector<8x8xbf16>, vector<16x8xbf16>, vector<8x16xf32> -> vector<8x16xf32>
    %cst_65 = arith.constant dense<0xFF800000> : vector<8xf32>
    %94 = vector.multi_reduction <maximumf>, %93, %cst_65 [1] : vector<8x16xf32> to vector<8xf32>
    %95 = vector.shape_cast %94 : vector<8xf32> to vector<8x1xf32>
    %96 = vector.broadcast %95 : vector<8x1xf32> to vector<8x16xf32>
    %97 = arith.subf %93, %96 : vector<8x16xf32>
    %98 = math.exp %97 : vector<8x16xf32>
    %cst_66 = arith.constant dense<0.000000e+00> : vector<8xf32>
    %99 = vector.multi_reduction <add>, %98, %cst_66 [1] : vector<8x16xf32> to vector<8xf32>
    %100 = vector.shape_cast %99 : vector<8xf32> to vector<8x1xf32>
    %101 = tpu.reciprocal %100 {approx = true} : vector<8x1xf32> -> vector<8x1xf32>
    %102 = vector.broadcast %101 : vector<8x1xf32> to vector<8x16xf32>
    %103 = arith.mulf %98, %102 : vector<8x16xf32>
    %104 = arith.truncf %103 : vector<8x16xf32> to vector<8x16xbf16>
    %cst_67 = arith.constant dense<0.000000e+00> : vector<8x8xf32>
    %105 = tpu.matmul %104, %91, %cst_67 {dimension_numbers = #tpu.dot_dimension_numbers<[1], [0], [0], [1], [0, 0, 1, 1], [], []>} : vector<8x16xbf16>, vector<16x8xbf16>, vector<8x8xf32> -> vector<8x8xf32>
    %106 = arith.truncf %105 : vector<8x8xf32> to vector<8x8xbf16>
    %c3_68 = arith.constant 3 : index
    %c0_69 = arith.constant 0 : index
    %c0_70 = arith.constant 0 : index
    %107 = vector.load %arg8[%c3_68, %c0_69, %c0_70] : memref<4x8x32xbf16, #tpu.memory_space<vmem>>, vector<1x8x32xbf16>
    %108 = vector.shape_cast %107 : vector<1x8x32xbf16> to vector<8x32xbf16>
    %cst_71 = arith.constant dense<0.000000e+00> : vector<8x32xf32>
    %109 = tpu.matmul %106, %108, %cst_71 {dimension_numbers = #tpu.dot_dimension_numbers<[1], [0], [0], [1], [0, 0, 1, 1], [], []>} : vector<8x8xbf16>, vector<8x32xbf16>, vector<8x32xf32> -> vector<8x32xf32>
    %110 = arith.addf %84, %109 : vector<8x32xf32>
    %111 = arith.addf %110, %4 : vector<8x32xf32>
    %cst_72 = arith.constant dense<0.000000e+00> : vector<8xf32>
    %112 = vector.multi_reduction <add>, %111, %cst_72 [1] : vector<8x32xf32> to vector<8xf32>
    %113 = vector.shape_cast %112 : vector<8xf32> to vector<8x1xf32>
    %cst_73 = arith.constant 3.200000e+01 : f32
    %114 = vector.broadcast %cst_73 : f32 to vector<8x1xf32>
    %115 = arith.divf %113, %114 : vector<8x1xf32>
    %116 = vector.broadcast %115 : vector<8x1xf32> to vector<8x32xf32>
    %117 = arith.subf %111, %116 : vector<8x32xf32>
    %118 = arith.mulf %117, %117 : vector<8x32xf32>
    %cst_74 = arith.constant dense<0.000000e+00> : vector<8xf32>
    %119 = vector.multi_reduction <add>, %118, %cst_74 [1] : vector<8x32xf32> to vector<8xf32>
    %120 = vector.shape_cast %119 : vector<8xf32> to vector<8x1xf32>
    %cst_75 = arith.constant 3.200000e+01 : f32
    %121 = vector.broadcast %cst_75 : f32 to vector<8x1xf32>
    %122 = arith.divf %120, %121 : vector<8x1xf32>
    %cst_76 = arith.constant 9.99999993E-9 : f32
    %123 = vector.broadcast %cst_76 : f32 to vector<8x1xf32>
    %124 = arith.addf %122, %123 : vector<8x1xf32>
    %125 = math.rsqrt %124 : vector<8x1xf32>
    %c0_77 = arith.constant 0 : index
    %c0_78 = arith.constant 0 : index
    %126 = vector.load %arg9[%c0_77, %c0_78] : memref<1x32xf32, #tpu.memory_space<vmem>>, vector<1x32xf32>
    %127 = vector.broadcast %125 : vector<8x1xf32> to vector<8x32xf32>
    %128 = vector.broadcast %126 : vector<1x32xf32> to vector<8x32xf32>
    %129 = arith.mulf %127, %128 : vector<8x32xf32>
    %130 = arith.mulf %117, %129 : vector<8x32xf32>
    %c0_79 = arith.constant 0 : index
    %c0_80 = arith.constant 0 : index
    %131 = vector.load %arg10[%c0_79, %c0_80] : memref<1x32xf32, #tpu.memory_space<vmem>>, vector<1x32xf32>
    %132 = vector.broadcast %131 : vector<1x32xf32> to vector<8x32xf32>
    %133 = arith.addf %130, %132 : vector<8x32xf32>
    %c0_81 = arith.constant 0 : index
    %c0_82 = arith.constant 0 : index
    %c0_83 = arith.constant 0 : index
    %134 = vector.load %arg11[%c0_81, %c0_82, %c0_83] : memref<1x8x32xf32, #tpu.memory_space<vmem>>, vector<1x8x32xf32>
    %135 = vector.shape_cast %134 : vector<1x8x32xf32> to vector<8x32xf32>
    %136 = vector.shape_cast %133 : vector<8x32xf32> to vector<1x8x32xf32>
    tpu.vector_store %arg11[%c0_81, %c0_82, %c0_83], %136 {strides = array<i32>} : memref<1x8x32xf32, #tpu.memory_space<vmem>>, vector<1x8x32xf32>,
    return
  }
  func.func @transform_0(%arg0: i32, %arg1: i32) -> (i32, i32, i32) {
    %c0_i32 = arith.constant 0 : i32
    %c0_i32_0 = arith.constant 0 : i32
    return %arg0, %arg1, %c0_i32 : i32, i32, i32
  }
  func.func @transform_1(%arg0: i32, %arg1: i32) -> (i32, i32, i32) {
    %c0_i32 = arith.constant 0 : i32
    %c0_i32_0 = arith.constant 0 : i32
    %c0_i32_1 = arith.constant 0 : i32
    return %arg0, %c0_i32, %c0_i32_0 : i32, i32, i32
  }
  func.func @transform_2(%arg0: i32, %arg1: i32) -> (i32, i32, i32) {
    %c0_i32 = arith.constant 0 : i32
    %c0_i32_0 = arith.constant 0 : i32
    %c0_i32_1 = arith.constant 0 : i32
    return %arg0, %c0_i32, %c0_i32_0 : i32, i32, i32
  }
  func.func @transform_3(%arg0: i32, %arg1: i32) -> (i32, i32, i32) {
    %c0_i32 = arith.constant 0 : i32
    %c0_i32_0 = arith.constant 0 : i32
    %c0_i32_1 = arith.constant 0 : i32
    %c0_i32_2 = arith.constant 0 : i32
    return %c0_i32, %c0_i32_0, %c0_i32_1 : i32, i32, i32
  }
  func.func @transform_4(%arg0: i32, %arg1: i32) -> (i32, i32, i32) {
    %c0_i32 = arith.constant 0 : i32
    %c0_i32_0 = arith.constant 0 : i32
    %c0_i32_1 = arith.constant 0 : i32
    %c0_i32_2 = arith.constant 0 : i32
    return %c0_i32, %c0_i32_0, %c0_i32_1 : i32, i32, i32
  }
  func.func @transform_5(%arg0: i32, %arg1: i32) -> (i32, i32, i32) {
    %c0_i32 = arith.constant 0 : i32
    %c0_i32_0 = arith.constant 0 : i32
    %c0_i32_1 = arith.constant 0 : i32
    %c0_i32_2 = arith.constant 0 : i32
    return %c0_i32, %c0_i32_0, %c0_i32_1 : i32, i32, i32
  }
  func.func @transform_6(%arg0: i32, %arg1: i32) -> (i32, i32, i32) {
    %c0_i32 = arith.constant 0 : i32
    %c0_i32_0 = arith.constant 0 : i32
    %c0_i32_1 = arith.constant 0 : i32
    %c0_i32_2 = arith.constant 0 : i32
    return %c0_i32, %c0_i32_0, %c0_i32_1 : i32, i32, i32
  }
  func.func @transform_7(%arg0: i32, %arg1: i32) -> (i32, i32) {
    %c0_i32 = arith.constant 0 : i32
    %c0_i32_0 = arith.constant 0 : i32
    %c0_i32_1 = arith.constant 0 : i32
    return %c0_i32, %c0_i32_0 : i32, i32
  }
  func.func @transform_8(%arg0: i32, %arg1: i32) -> (i32, i32) {
    %c0_i32 = arith.constant 0 : i32
    %c0_i32_0 = arith.constant 0 : i32
    %c0_i32_1 = arith.constant 0 : i32
    return %c0_i32, %c0_i32_0 : i32, i32
  }
  func.func @transform_9(%arg0: i32, %arg1: i32) -> (i32, i32, i32) {
    %c0_i32 = arith.constant 0 : i32
    %c0_i32_0 = arith.constant 0 : i32
    return %arg0, %arg1, %c0_i32 : i32, i32, i32
  }
}

</mosaic_0001>

<bundles_post_ra>
// kernel: tpu_custom_call.1
= control target key start
LH: loop header
LB: loop body
LE: loop exit
PB: predicated region body
PF: predicated region fallthrough
CT: control target
= control target key end

     0   :  { %14 = vsyncpa [#allocation5], 0  ;;  %s2125_s0 = inlined_call_operand.vmem [shape: f32[2,16,32], index: 0, kind: input, shape index: {}]   ;;  %s2126_s1 = inlined_call_operand.vmem [shape: f32[2,16,32], index: 1, kind: input, shape index: {}]   ;;  %s2127_s2 = inlined_call_operand.vmem [shape: f32[2,16,32], index: 2, kind: input, shape index: {}]   ;;  %s2128_s3 = inlined_call_operand.vmem [shape: bf16[4,32,8], index: 3, kind: input, shape index: {}]   ;;  %s2129_s4 = inlined_call_operand.vmem [shape: bf16[4,32,8], index: 4, kind: input, shape index: {}]   ;;  %s2130_s5 = inlined_call_operand.vmem [shape: bf16[4,32,8], index: 5, kind: input, shape index: {}]   ;;  %s2131_s6 = inlined_call_operand.vmem [shape: bf16[4,8,32], index: 6, kind: input, shape index: {}]   ;;  %s2132_s7 = inlined_call_operand.vmem [shape: f32[1,32], index: 7, kind: input, shape index: {}]   ;;  %s2133_s8 = inlined_call_operand.vmem [shape: f32[1,32], index: 8, kind: input, shape index: {}]   ;;  %s2134_s9 = inlined_call_operand.hbm [shape: f32[2,16,32], index: 9, kind: output, shape index: {}]  }
   0x1   :  { %16 = vsyncpa [#allocation5 + $0x1], 0  ;;  %s1819_s30 = smov 0   ;;  %s1821_s10 = smov 0  }
   0x2   :  { %s1823_s11 = smov 0   ;;  %s1825_s12 = smov 0  }
   0x3   :  { %s1827_s13 = smov 0   ;;  %s1829_s14 = smov 0  }
   0x4   :  { %s1831_s15 = smov 0   ;;  %s1833_s16 = smov 0  }
   0x5 LB: > { %2145 = sst [smem:[#allocation7_spill]] %s1738_s30  ;;  %s1335_s17 = sadd.s32 4294967295, %s1766_s16   ;;  %s1766_s16 = sphi %s1833_s16, %s22_s16   ;;  %s1762_s15 = sphi %s1831_s15, %s2165_s15   ;;  %s1758_s14 = sphi %s1829_s14, %s2164_s14   ;;  %s1754_s13 = sphi %s1827_s13, %s2163_s13   ;;  %s1750_s12 = sphi %s1825_s12, %s2168_s12   ;;  %s1746_s11 = sphi %s1823_s11, %s2161_s11   ;;  %s1742_s10 = sphi %s1821_s10, %s2167_s10   ;;  %s1738_s30 = sphi %s1819_s30, %s2166_s30  }
   0x6   : > { %2146 = sst [smem:[#allocation8_spill]] %s1746_s11  ;;  %s1336_s18 = sadd.s32 4294967294, %s1766_s16  }
   0x7   : > { %2147 = sst [smem:[#allocation9_spill]] %s1758_s14  ;;  %s31_s19 = sadd.s32 1, %s1758_s14 }
   0x8   : > { %2148 = sst [smem:[#allocation10_spill]] %s1762_s15  ;;  %p32_p0 = scmp.ge.s32.totalorder %s31_s19, 2 }
   0x9   : > { %2149 = sst [smem:[#allocation11_spill]] %s1766_s16  ;;  %s34_s20 = sadd.s32 1, %s1762_s15 }
   0xa   : > { %p259_p1 = scmp.ne.s32.totalorder %s1746_s11, %s1742_s10  ;;  %p260_p2 = scmp.eq.s32.totalorder %s1335_s17, 3 }
   0xb   : > { %s2170_s19 = smov (%p32_p0, %s31_s19), 0  ;;  %s2172_s20 = smov (!%p32_p0, %s34_s20), %s1762_s15 }
   0xc   : > { %2150 = sst [smem:[#allocation12_spill]] %s2170_s19  ;;  %s245_s21 = ssub.s32 %s1758_s14, %s2170_s19 }
   0xd   : > { %p1870_p3 = por %p260_p2, %p259_p1  ;;  %p36_p4 = scmp.ge.s32.totalorder %s2172_s20, 2 }
   0xe   : > { %p265_p5 = scmp.ne.s32.totalorder %s1742_s10, %s1738_s30  ;;  %p266_p6 = scmp.eq.s32.totalorder %s1336_s18, 3 }
   0xf   : > { %p1339_p7 = scmp.ge.s32.totalorder %s1766_s16, 1  ;;  %s2174_s20 = smov (%p36_p4, %s2172_s20), 0 }
  0x10   : > { %2152 = sst [smem:[#allocation13_spill]] %s2174_s20  ;;  %p1879_p8 = por %p266_p6, %p265_p5 }
  0x11   : > { %p329_p9 = scmp.lt.s32.totalorder %s1766_s16, 5  ;;  %s244_s24 = ssub.s32 %s1762_s15, %s2174_s20 }
  0x12   : > { %s2153_s23 = scalar_select %p1879_p8, 1, 0 }
  0x13   : > { %s249_s25 = sadd.s32 1, %s1746_s11  ;;  %s246_s26 = sor.u32 %s245_s21, %s244_s24 }
  0x14   : > { %2154 = sst [smem:[#allocation14_spill]] %s2153_s23  ;;  %p330_p10 = pnand %p1339_p7, %p329_p9 }
  0x15   : > { %p247_p11 = scmp.eq.s32.totalorder %s246_s26, 0  ;;  %s2142_s28 = sand.u32 (!%p330_p10), 1, %s1742_s10  }
  0x16   : > { %333 = sbr.rel (%p330_p10) target bundleno = 2078 (0x81e), region = 56  ;;  %p378_p12 = scmp.lt.s32.totalorder (!%p330_p10), %s1754_s13, 1 }
  0x17   : > { %s1888_s27 = scalar_select %p247_p11, %s1746_s11, %s249_s25  }
  0x18   : > { %s1894_s29 = sshll.u32 (!%p330_p10), %s2142_s28, 3  ;;  %p380_p13 = scmp.lt.s32.totalorder (!%p330_p10), %s1750_s12, 1 }
  0x19   : > { %2155 = sst [smem:[#allocation15_spill]] %s1888_s27  ;;  %s377_s16 = scalar_lea.vmem (!%p330_p10), [#allocation4], %s1894_s29 }
  0x1a   : > { %p1347_p0 = scmp.ne.s32.totalorder (!%p330_p10), %s1750_s12, 0 }
  0x1b   : > { %s379_s17 = scalar_select %p378_p12, %s1754_s13, 1 }
  0x1c   : > { %s381_s18 = scalar_select %p380_p13, %s1750_s12, 1 }
  0x1d   : > { %s1341_s21 = sshll.u32 %s379_s17, 1  ;;  %s1544_s24 = sshll.u32 %s379_s17, 4 }
  0x1e   : > { %s383_s25 = sadd.s32 %s1341_s21, %s381_s18  ;;  %s390_s19 = scalar_lea.vmem %s2126_s1, %s1544_s24 }
  0x1f   : > { %s1342_s15 = sshll.u32 %s383_s25, 3  ;;  %s395_s11 = scalar_lea.vmem %s2127_s2, %s1544_s24 }
  0x20   : > { %s1908_s28 = scalar_lea.vmem %s2125_s0, %s1342_s15  ;;  %400 = sbr.rel (%p1347_p0) target bundleno = 207 (0xcf), region = 60 }
  0x25   : > { %v1547_v0 = vld [vmem:[%s2129_s4 + $0x8] sm:$0xff]  ;;  %v1551_v2 = vld [vmem:[%s2129_s4 + $0x18] sm:$0xff]  ;;  %v1546_v4 = vld [vmem:[%s2129_s4] sm:$0xff]  ;;  %vm423_vm0 = vcmask 261120   ;;  %vm443_vm1 = vcmask 60416  }
  0x26   : > { %v1549_v1 = vld [vmem:[%s2130_s5 + $0x8] sm:$0xff]  ;;  %v1553_v3 = vld [vmem:[%s2130_s5 + $0x18] sm:$0xff]  ;;  %v1548_v5 = vld [vmem:[%s2130_s5] sm:$0xff]  ;;  %433 = vmatpush.bf16.msra.mxu0 %v1547_v0  ;;  %506 = vmatpush.bf16.msra.mxu2 %v1551_v2 }
  0x27   : > { %471 = vmatpush.bf16.msra.mxu1 %v1549_v1  ;;  %v1550_v6 = vld [vmem:[%s2129_s4 + $0x10] sm:$0xff]  ;;  %v401_v8 = vld [vmem:[%s390_s19] sm:$0xff]  ;;  %542 = vmatpush.bf16.msra.mxu3 %v1553_v3  ;;  %v402_v9 = vld [vmem:[%s390_s19 + $0x8] sm:$0xff] }
  0x28   : > { %v1552_v7 = vld [vmem:[%s2130_s5 + $0x10] sm:$0xff]  ;;  %v404_v10 = vld [vmem:[%s395_s11] sm:$0xff]  ;;  %v405_v11 = vld [vmem:[%s395_s11 + $0x8] sm:$0xff]  ;;  %v403_v14 = vpack.c.bf16 %v402_v9, %v401_v8 }
  0x29   : > { %v1559_v12 = vld [vmem:[%s2129_s4 + $0x38] sm:$0xff]  ;;  %v406_v15 = vpack.c.bf16 %v405_v11, %v404_v10  ;;  %v1555_v16 = vld [vmem:[%s2129_s4 + $0x28] sm:$0xff]  ;;  %v1558_v18 = vld [vmem:[%s2129_s4 + $0x30] sm:$0xff] }
  0x2a   : > { %v1561_v13 = vld [vmem:[%s2130_s5 + $0x38] sm:$0xff]  ;;  %434 = vmatpush.bf16.msra.mxu0 %v1546_v4  ;;  %507 = vmatpush.bf16.msra.mxu2 %v1550_v6  ;;  %v1557_v17 = vld [vmem:[%s2130_s5 + $0x28] sm:$0xff]  ;;  %v1560_v19 = vld [vmem:[%s2130_s5 + $0x30] sm:$0xff] }
  0x2b   : > { %472 = vmatpush.bf16.msra.mxu1 %v1548_v5  ;;  %543 = vmatpush.bf16.msra.mxu3 %v1552_v7  ;;  %v1554_v20 = vld [vmem:[%s2129_s4 + $0x20] sm:$0xff] }
  0x2c   : > { %v1556_v21 = vld [vmem:[%s2130_s5 + $0x20] sm:$0xff] }
  0x2d   : > { %1356 = vmatmul.msk.bf16.vlgmr.msra.gmra.mxu0 %vm423_vm0, %v403_v14  ;;  %1378 = vmatmul.msk.bf16.vlgmr.msra.gmra.mxu2 %vm423_vm0, %v403_v14 }
  0x2e   : > { %650 = vmatpush.bf16.msrb.mxu2 %v1559_v12  ;;  %1365 = vmatmul.msk.bf16.vlgmr.msra.gmra.mxu1 %vm423_vm0, %v406_v15 }
  0x2f   : > { %686 = vmatpush.bf16.msrb.mxu3 %v1561_v13  ;;  %578 = vmatpush.bf16.msrb.mxu0 %v1555_v16 }
  0x30   : > { %1391 = vmatmul.msk.bf16.vlgmr.msra.gmra.mxu3 %vm423_vm0, %v406_v15  ;;  %614 = vmatpush.bf16.msrb.mxu1 %v1557_v17 }
  0x32   : > { %651 = vmatpush.bf16.msrb.mxu2 %v1558_v18 }
  0x33   : > { %687 = vmatpush.bf16.msrb.mxu3 %v1560_v19  ;;  %579 = vmatpush.bf16.msrb.mxu0 %v1554_v20 }
  0x34   : > { %615 = vmatpush.bf16.msrb.mxu1 %v1556_v21 }
  0x3d   : > { %1404 = vmatmul.msk.bf16.vlgmr.msrb.gmra.mxu0 %vm423_vm0, %v403_v14  ;;  %1430 = vmatmul.msk.bf16.vlgmr.msrb.gmra.mxu2 %vm423_vm0, %v403_v14 }
  0x3e   : > { %1417 = vmatmul.msk.bf16.vlgmr.msrb.gmra.mxu1 %vm423_vm0, %v406_v15 }
  0x40   : > { %1443 = vmatmul.msk.bf16.vlgmr.msrb.gmra.mxu3 %vm423_vm0, %v406_v15 }
  0xaa   : > { %v436_v22 = vpop.f32.mrf.mxu0 }
  0xab   : > { %v474_v23 = vpop.f32.mrf.mxu1  ;;  %v441_v24 = vpack.c.bf16 %v436_v22, %v436_v22 }
  0xac   : > { %v479_v25 = vpack.c.bf16 %v474_v23, %v474_v23 }
  0xad   : > { %444 = vst.msk [vmem:[#allocation2] sm:$0xf] %vm443_vm1, %v441_v24 }
  0xae   : > { %481 = vst.msk [vmem:[#allocation3] sm:$0xf] %vm443_vm1, %v479_v25 }
  0xb0   : > { %v509_v26 = vpop.f32.mrf.mxu2 }
  0xb1   : > { %v514_v28 = vpack.c.bf16 %v509_v26, %v509_v26 }
  0xb2   : > { %v438_v30 = vpop.f32.mrf.mxu0 }
  0xb3   : > { %v545_v27 = vpop.f32.mrf.mxu3  ;;  %v476_v31 = vpop.f32.mrf.mxu1  ;;  %v442_v32 = vpack.c.bf16 %v438_v30, %v438_v30  ;;  %517 = vst.msk [vmem:[#allocation2 + $0x8] sm:$0xf] %vm443_vm1, %v514_v28 }
  0xb4   : > { %v550_v29 = vpack.c.bf16 %v545_v27, %v545_v27  ;;  %v480_v33 = vpack.c.bf16 %v476_v31, %v476_v31 }
  0xb5   : > { %445 = vst.msk [vmem:[#allocation2 + $0x4] sm:$0xf] %vm443_vm1, %v442_v32 }
  0xb6   : > { %553 = vst.msk [vmem:[#allocation3 + $0x8] sm:$0xf] %vm443_vm1, %v550_v29 }
  0xb7   : > { %482 = vst.msk [vmem:[#allocation3 + $0x4] sm:$0xf] %vm443_vm1, %v480_v33 }
  0xb8   : > { %v511_v34 = vpop.f32.mrf.mxu2 }
  0xb9   : > { %v515_v36 = vpack.c.bf16 %v511_v34, %v511_v34 }
  0xba   : > { %v581_v38 = vpop.f32.mrf.mxu0 }
  0xbb   : > { %v547_v35 = vpop.f32.mrf.mxu3  ;;  %v617_v39 = vpop.f32.mrf.mxu1  ;;  %v586_v40 = vpack.c.bf16 %v581_v38, %v581_v38  ;;  %518 = vst.msk [vmem:[#allocation2 + $0xc] sm:$0xf] %vm443_vm1, %v515_v36 }
  0xbc   : > { %v551_v37 = vpack.c.bf16 %v547_v35, %v547_v35  ;;  %v622_v41 = vpack.c.bf16 %v617_v39, %v617_v39 }
  0xbd   : > { %589 = vst.msk [vmem:[#allocation2 + $0x10] sm:$0xf] %vm443_vm1, %v586_v40 }
  0xbe   : > { %554 = vst.msk [vmem:[#allocation3 + $0xc] sm:$0xf] %vm443_vm1, %v551_v37 }
  0xbf   : > { %625 = vst.msk [vmem:[#allocation3 + $0x10] sm:$0xf] %vm443_vm1, %v622_v41 }
  0xc0   : > { %v653_v42 = vpop.f32.mrf.mxu2 }
  0xc1   : > { %v658_v44 = vpack.c.bf16 %v653_v42, %v653_v42 }
  0xc2   : > { %v583_v46 = vpop.f32.mrf.mxu0 }
  0xc3   : > { %v689_v43 = vpop.f32.mrf.mxu3  ;;  %v619_v47 = vpop.f32.mrf.mxu1  ;;  %v587_v48 = vpack.c.bf16 %v583_v46, %v583_v46  ;;  %661 = vst.msk [vmem:[#allocation2 + $0x18] sm:$0xf] %vm443_vm1, %v658_v44 }
  0xc4   : > { %v694_v45 = vpack.c.bf16 %v689_v43, %v689_v43  ;;  %v623_v49 = vpack.c.bf16 %v619_v47, %v619_v47 }
  0xc5   : > { %590 = vst.msk [vmem:[#allocation2 + $0x14] sm:$0xf] %vm443_vm1, %v587_v48 }
  0xc6   : > { %697 = vst.msk [vmem:[#allocation3 + $0x18] sm:$0xf] %vm443_vm1, %v694_v45 }
  0xc7   : > { %626 = vst.msk [vmem:[#allocation3 + $0x14] sm:$0xf] %vm443_vm1, %v623_v49 }
  0xc8   : > { %v655_v50 = vpop.f32.mrf.mxu2 }
  0xc9   : > { %v659_v52 = vpack.c.bf16 %v655_v50, %v655_v50 }
  0xcb   : > { %v691_v51 = vpop.f32.mrf.mxu3  ;;  %662 = vst.msk [vmem:[#allocation2 + $0x1c] sm:$0xf] %vm443_vm1, %v659_v52 }
  0xcc   : > { %v695_v53 = vpack.c.bf16 %v691_v51, %v691_v51 }
  0xce   : > { %698 = vst.msk [vmem:[#allocation3 + $0x1c] sm:$0xf] %vm443_vm1, %v695_v53 }
  0xcf PF: > { %v1563_v54 = vld [vmem:[%s2128_s3 + $0x8] sm:$0xff]  ;;  %vm744_vm2 = vcmask 64512   ;;  %v1564_v55 = vld [vmem:[#allocation2] sm:$0xff]  ;;  %vm717_vm3 = vcmask 261120   ;;  %vm764_vm4 = vcmask 130048   ;;  %v1567_v2 = vld [vmem:[%s2128_s3 + $0x18] sm:$0xff] }
  0xd0   : > { %727 = vmatpush.bf16.msra.mxu0 %v1563_v54  ;;  %v1562_v56 = vld [vmem:[%s2128_s3] sm:$0xff]  ;;  %v749_v58 = vsel %vm744_vm2, %v1564_v55, 0  ;;  %824 = vmatpush.bf16.msra.mxu3 %v1567_v2  ;;  %v1566_v3 = vld [vmem:[%s2128_s3 + $0x10] sm:$0xff]  ;;  %v1568_v10 = vld [vmem:[#allocation2 + $0x8] sm:$0xff]  ;;  %vm902_vm5 = vcmask 1043456   ;;  %s1540_s17 = sshll.u32 %s1754_s13, 1 }
  0xd1   : > { %v1991_v57 = vld [vmem:[%s1908_s28] sm:$0xff]  ;;  %758 = vmatpush.bf16.xpose.msra.mxu1 %v749_v58  ;;  %v847_v11 = vsel %vm744_vm2, %v1568_v10, 0  ;;  %v1571_v27 = vld [vmem:[%s2128_s3 + $0x28] sm:$0xff]  ;;  %v1575_v29 = vld [vmem:[%s2128_s3 + $0x38] sm:$0xff]  ;;  %s1226_s18 = sadd.s32 %s1750_s12, %s1540_s17  ;;  %s1230_s15 = sshll.u32 %s377_s16, 4  ;;  %s1231_s15 = int_to_ptr.vmem [resolvable:$true] %s1230_s15 }
  0xd2   : > { %v1996_v59 = vpack.c.bf16 %v1991_v57, %v1991_v57  ;;  %v1565_v9 = vld [vmem:[#allocation3] sm:$0xff]  ;;  %v1569_v30 = vld [vmem:[#allocation3 + $0x8] sm:$0xff]  ;;  %v1574_v31 = vld [vmem:[%s2128_s3 + $0x30] sm:$0xff]  ;;  %s1541_s20 = sshll.u32 %s1226_s18, 3  ;;  %s2156_s28 = sand.u32 1, %s1742_s10  }
  0xd3   : > { %793 = vmatpush.bf16.msra.mxu2 %v1565_v9  ;;  %v800_v19 = vld [vmem:[%s2131_s6] sm:$0xf]  ;;  %v1572_v39 = vld [vmem:[#allocation2 + $0x10] sm:$0xff]  ;;  %v1576_v45 = vld [vmem:[#allocation2 + $0x18] sm:$0xff]  ;;  %s1228_s30 = scalar_lea.hbm %s2134_s9, %s1541_s20  ;;  %s1216_s11 = scalar_lea.sflag [#allocation5], %s2156_s28 }
  0xd4   : > { %728 = vmatpush.bf16.msra.mxu0 %v1562_v56  ;;  %825 = vmatpush.bf16.msra.mxu3 %v1566_v3  ;;  %v923_v20 = vsel %vm902_vm5, %v800_v19, 0  ;;  %v1570_v28 = vld [vmem:[%s2128_s3 + $0x20] sm:$0xff]  ;;  %v984_v40 = vsel %vm744_vm2, %v1572_v39, 0  ;;  %v1102_v50 = vsel %vm744_vm2, %v1576_v45, 0  ;;  %v1573_v2 = vld [vmem:[#allocation3 + $0x10] sm:$0xff]  ;;  %s1232_s23 = sshll.u32 %s1228_s30, 4  ;;  %s1233_s23 = int_to_ptr.hbm [resolvable:$true] %s1232_s23 }
  0xd5   : > { %v1486_v53 = vld [vmem:[%s2131_s6 + $0x4] sm:$0xf]  ;;  %s1686_s19 = sshra.s32 %s1233_s23, 4  ;;  %s1692_s18 = scalar_lea.hbm %s2134_s9, 32  ;;  %s1687_s19 = int_to_ptr.hbm [resolvable:$true] %s1686_s19 }
  0xd6   : > { %v904_v54 = vsel %vm902_vm5, %v1486_v53, 0  ;;  %s1688_s24 = scalar_lea.hbm %s1687_s19, 8  ;;  %p1693_p5 = scmp.lt.s32.totalorder %s1687_s19, %s2134_s9 }
  0xd7   : > { %1452 = vmatmul.msk.bf16.vlgmr.msra.gmra.mxu0 %vm717_vm3, %v1996_v59  ;;  %1475 = vmatmul.msk.bf16.vlgmr.msra.gmra.mxu3 %vm717_vm3, %v1996_v59  ;;  %p1689_p1 = scmp.ne.s32.totalorder %s1687_s19, %s1688_s24  ;;  %p1694_p6 = scmp.lt.s32.totalorder %s1692_s18, %s1688_s24 }
  0xd8   : > { %856 = vmatpush.bf16.xpose.msrb.mxu2 %v847_v11  ;;  %932 = vmatpush.bf16.msrb.mxu3 %v923_v20 }
  0xd9   : > { %890 = vmatpush.bf16.msrb.mxu0 %v1569_v30  ;;  %913 = vmatpush.bf16.msrb.mxu1 %v904_v54  ;;  %p1690_p2 = pnand %p1689_p1, %p1870_p3  ;;  %p1695_p7 = por %p1694_p6, %p1693_p5 }
  0xdb   : > { %p1691_p4 = pneg %p1690_p2 }
  0xdd   : > { %993 = vmatpush.bf16.xpose.msra.mxu0 %v984_v40  ;;  %p1696_p9 = pnand %p1695_p7, %p1691_p4 }
 0x154   : > { %v730_v60 = vpop.f32.mrf.mxu0 }
 0x155   : > { %v738_v61 = vpack.c.bf16 %v730_v60, %v730_v60 }
 0x157   : > { %1457 = vmatmul.msk.bf16.vlgmr.msra.gmra.mxu1 %vm744_vm2, %v738_v61 }
 0x158   : > { %1027 = vmatpush.bf16.msra.mxu1 %v1573_v2  ;;  %v1651_v2 = vld [vmem:[%s2133_s8] ss:$0 sm:$0xff] }
 0x15a   : > { %v827_v12 = vpop.f32.mrf.mxu3 }
 0x15b   : > { %v837_v18 = vpack.c.bf16 %v827_v12, %v827_v12 }
 0x15c   : > { %v732_v62 = vpop.f32.mrf.mxu0 }
 0x162   : > { %v829_v13 = vpop.f32.mrf.mxu3 }
 0x1d4   : > { %v760_v63 = vpop.f32.mrf.mxu1 }
 0x1d5   : > { %v765_v0 = vsel %vm764_vm4, %v760_v63, -inf }
 0x1d6   : > { %766 = vmax.xlane.f32.xlu0 %v765_v0 }
 0x1dc   : > { %v762_v1 = vpop.f32.mrf.mxu1 }
 0x249   : > { %v767_v4 = vpop.xlane.xlu0 %766 }
 0x24a   : > { %v768_v5 = vsub.f32 %v760_v63, %v767_v4 }
 0x24c   : > { %v769_v6 = vmul.f32 1.442695, %v768_v5 }
 0x24e   : > { %1652 = vpow2.f32 %v769_v6 }
 0x254   : > { %v1653_v7 = vpop.eup %1652 }
 0x255   : > { %v771_v8 = vsel %vm764_vm4, %v1653_v7, 0.0 }
 0x256   : > { %772 = vadd.xlane.f32.xlu0 %v771_v8 }
 0x2c9   : > { %v773_v14 = vpop.xlane.xlu0 %772 }
 0x2ca   : > { %1654 = vrcp.f32 %v773_v14  ;;  %v1577_v14 = vld [vmem:[#allocation3 + $0x18] sm:$0xff] }
 0x2d0   : > { %v1655_v15 = vpop.eup %1654 }
 0x2d1   : > { %v775_v16 = vmul.f32 %v1655_v15, %v1653_v7  ;;  %v1512_v15 = vld [vmem:[%s2131_s6 + $0x8] sm:$0xf] }
 0x2d3   : > { %v776_v17 = vpack.c.bf16 %v775_v16, %v775_v16  ;;  %v1040_v16 = vsel %vm902_vm5, %v1512_v15, 0 }
 0x2d4   : > { %1049 = vmatpush.bf16.msra.mxu3 %v1040_v16 }
 0x2d5   : > { %1462 = vmatmul.msk.bf16.vlgmr.msra.gmra.mxu2 %vm764_vm4, %v776_v17 }
 0x2d6   : > { %961 = vmatpush.bf16.msra.mxu2 %v1571_v27 }
 0x2da   : > { %962 = vmatpush.bf16.msra.mxu2 %v1570_v28 }
 0x2e5   : > { %1480 = vmatmul.msk.bf16.vlgmr.msrb.gmra.mxu2 %vm744_vm2, %v837_v18 }
 0x2e6   : > { %1079 = vmatpush.bf16.msrb.mxu2 %v1575_v29 }
 0x2ea   : > { %1080 = vmatpush.bf16.msrb.mxu2 %v1574_v31 }
 0x2f5   : > { %1501 = vmatmul.msk.bf16.vlgmr.msra.gmra.mxu2 %vm717_vm3, %v1996_v59 }
 0x305   : > { %1526 = vmatmul.msk.bf16.vlgmr.msrb.gmra.mxu2 %vm717_vm3, %v1996_v59 }
 0x358   : > { %v795_v21 = vpop.f32.mrf.mxu2 }
 0x359   : > { %v799_v22 = vpack.c.bf16 %v795_v21, %v795_v21 }
 0x35b   : > { %1488 = vmatmul.msk.bf16.vlgmr.msrb.gmra.mxu3 %vm744_vm2, %v799_v22 }
 0x360   : > { %v797_v23 = vpop.f32.mrf.mxu2 }
 0x368   : > { %v858_v24 = vpop.f32.mrf.mxu2 }
 0x369   : > { %v862_v25 = vsel %vm764_vm4, %v858_v24, -inf }
 0x36a   : > { %863 = vmax.xlane.f32.xlu1 %v862_v25  ;;  %v1537_v25 = vld [vmem:[%s2131_s6 + $0xc] sm:$0xf] }
 0x370   : > { %v860_v26 = vpop.f32.mrf.mxu2 }
 0x371   : > { %v1158_v26 = vsel %vm902_vm5, %v1537_v25, 0 }
 0x372   : > { %1167 = vmatpush.bf16.msrb.mxu3 %v1158_v26 }
 0x378   : > { %v964_v41 = vpop.f32.mrf.mxu2 }
 0x379   : > { %v974_v51 = vpack.c.bf16 %v964_v41, %v964_v41 }
 0x380   : > { %v966_v42 = vpop.f32.mrf.mxu2 }
 0x388   : > { %v1082_v44 = vpop.f32.mrf.mxu2 }
 0x389   : > { %v1092_v52 = vpack.c.bf16 %v1082_v44, %v1082_v44 }
 0x390   : > { %v1084_v48 = vpop.f32.mrf.mxu2 }
 0x3dd   : > { %v864_v32 = vpop.xlane.xlu1 %863 }
 0x3de   : > { %v865_v33 = vsub.f32 %v858_v24, %v864_v32  ;;  %v2036_v34 = vpop.f32.mrf.mxu3 }
 0x3e0   : > { %v866_v35 = vmul.f32 1.442695, %v865_v33 }
 0x3e2   : > { %1656 = vpow2.f32 %v866_v35 }
 0x3e6   : > { %v936_v36 = vpop.f32.mrf.mxu3 }
 0x3e8   : > { %v1657_v37 = vpop.eup %1656 }
 0x3e9   : > { %v868_v38 = vsel %vm764_vm4, %v1657_v37, 0.0 }
 0x3ea   : > { %869 = vadd.xlane.f32.xlu1 %v868_v38 }
 0x45d   : > { %v870_v43 = vpop.xlane.xlu1 %869 }
 0x45e   : > { %1658 = vrcp.f32 %v870_v43  ;;  %v1768_v43 = vmov 32.0  }
 0x464   : > { %v1659_v46 = vpop.eup %1658 }
 0x465   : > { %v872_v47 = vmul.f32 %v1659_v46, %v1657_v37 }
 0x467   : > { %v873_v49 = vpack.c.bf16 %v872_v47, %v872_v47 }
 0x469   : > { %1485 = vmatmul.msk.bf16.vlgmr.msrb.gmra.mxu0 %vm764_vm4, %v873_v49 }
 0x46a   : > { %1111 = vmatpush.bf16.xpose.msrb.mxu0 %v1102_v50 }
 0x479   : > { %1506 = vmatmul.msk.bf16.vlgmr.msra.gmra.mxu0 %vm744_vm2, %v974_v51 }
 0x489   : > { %1531 = vmatmul.msk.bf16.vlgmr.msrb.gmra.mxu0 %vm744_vm2, %v1092_v52 }
 0x4e6   : > { %v892_v55 = vpop.f32.mrf.mxu0 }
 0x4e7   : > { %v896_v56 = vpack.c.bf16 %v892_v55, %v892_v55 }
 0x4e9   : > { %1487 = vmatmul.msk.bf16.vlgmr.msrb.gmra.mxu1 %vm744_vm2, %v896_v56 }
 0x4ea   : > { %1145 = vmatpush.bf16.msrb.mxu1 %v1577_v14 }
 0x4ee   : > { %v894_v58 = vpop.f32.mrf.mxu0 }
 0x4f6   : > { %v995_v59 = vpop.f32.mrf.mxu0 }
 0x4f7   : > { %v999_v60 = vsel %vm764_vm4, %v995_v59, -inf }
 0x4f8   : > { %1000 = vmax.xlane.f32.xlu2 %v999_v60 }
 0x4fe   : > { %v997_v61 = vpop.f32.mrf.mxu0 }
 0x506   : > { %v1113_v62 = vpop.f32.mrf.mxu0 }
 0x507   : > { %v1117_v63 = vsel %vm764_vm4, %v1113_v62, -inf }
 0x508   : > { %1118 = vmax.xlane.f32.xlu2 %v1117_v63 }
 0x50e   : > { %v1115_v0 = vpop.f32.mrf.mxu0 }
 0x566   : > { %v915_v1 = vpop.f32.mrf.mxu1 }
 0x567   : > { %v935_v36 = vadd.f32 %v2036_v34, %v915_v1 }
 0x56b   : > { %v1001_v3 = vpop.xlane.xlu2 %1000 }
 0x56c   : > { %v1002_v4 = vsub.f32 %v995_v59, %v1001_v3 }
 0x56e   : > { %v1003_v5 = vmul.f32 1.442695, %v1002_v4  ;;  %v917_v6 = vpop.f32.mrf.mxu1 }
 0x570   : > { %1660 = vpow2.f32 %v1003_v5 }
 0x576   : > { %v1661_v7 = vpop.eup %1660 }
 0x577   : > { %v1005_v8 = vsel %vm764_vm4, %v1661_v7, 0.0 }
 0x578   : > { %1006 = vadd.xlane.f32.xlu0 %v1005_v8 }
 0x57b   : > { %v1119_v9 = vpop.xlane.xlu2 %1118 }
 0x57c   : > { %v1120_v10 = vsub.f32 %v1113_v62, %v1119_v9  ;;  %v1650_v62 = vld [vmem:[%s2132_s7] ss:$0 sm:$0xff] }
 0x57e   : > { %v1121_v11 = vmul.f32 1.442695, %v1120_v10 }
 0x580   : > { %1662 = vpow2.f32 %v1121_v11 }
 0x586   : > { %v1663_v12 = vpop.eup %1662 }
 0x587   : > { %v1123_v13 = vsel %vm764_vm4, %v1663_v12, 0.0 }
 0x588   : > { %1124 = vadd.xlane.f32.xlu1 %v1123_v13 }
 0x5eb   : > { %v1007_v17 = vpop.xlane.xlu0 %1006 }
 0x5ec   : > { %1664 = vrcp.f32 %v1007_v17 }
 0x5f2   : > { %v1665_v18 = vpop.eup %1664 }
 0x5f3   : > { %v1009_v19 = vmul.f32 %v1665_v18, %v1661_v7 }
 0x5f5   : > { %v1010_v20 = vpack.c.bf16 %v1009_v19, %v1009_v19 }
 0x5f7   : > { %1511 = vmatmul.msk.bf16.vlgmr.msra.gmra.mxu1 %vm764_vm4, %v1010_v20 }
 0x5fb   : > { %v1125_v21 = vpop.xlane.xlu1 %1124 }
 0x5fc   : > { %1666 = vrcp.f32 %v1125_v21 }
 0x5fd   : > { %1668 = vrcp.f32 %v1768_v43 }
 0x602   : > { %v1667_v22 = vpop.eup %1666 }
 0x603   : > { %v1127_v23 = vmul.f32 %v1667_v22, %v1663_v12  ;;  %v1669_v44 = vpop.eup %1668 }
 0x604   : > { %v1179_v45 = vmul.f32 32.0, %v1669_v44  ;;  %vm1183_vm6 = vweird.f32 %v1669_v44 }
 0x605   : > { %v1128_v24 = vpack.c.bf16 %v1127_v23, %v1127_v23 }
 0x606   : > { %v1180_v46 = vsub.f32 1.0, %v1179_v45 }
 0x607   : > { %1536 = vmatmul.msk.bf16.vlgmr.msrb.gmra.mxu1 %vm764_vm4, %v1128_v24 }
 0x608   : > { %v1181_v47 = vmul.f32 %v1669_v44, %v1180_v46 }
 0x60a   : > { %v1182_v48 = vadd.f32 %v1669_v44, %v1181_v47 }
 0x60c   : > { %v1184_v34 = vsel %vm1183_vm6, %v1669_v44, %v1182_v48 }
 0x674   : > { %v1029_v27 = vpop.f32.mrf.mxu1 }
 0x675   : > { %v1033_v28 = vpack.c.bf16 %v1029_v27, %v1029_v27 }
 0x677   : > { %1513 = vmatmul.msk.bf16.vlgmr.msra.gmra.mxu3 %vm744_vm2, %v1033_v28 }
 0x67c   : > { %v1031_v29 = vpop.f32.mrf.mxu1 }
 0x684   : > { %v1147_v30 = vpop.f32.mrf.mxu1 }
 0x685   : > { %v1151_v31 = vpack.c.bf16 %v1147_v30, %v1147_v30 }
 0x687   : > { %1538 = vmatmul.msk.bf16.vlgmr.msrb.gmra.mxu3 %vm744_vm2, %v1151_v31 }
 0x68c   : > { %v1149_v32 = vpop.f32.mrf.mxu1 }
 0x6fa   : > { %v1051_v33 = vpop.f32.mrf.mxu3 }
 0x6fb   : > { %v1055_v37 = vadd.f32 %v1051_v33, %v935_v36 }
 0x702   : > { %v1053_v35 = vpop.f32.mrf.mxu3 }
 0x70a   : > { %v1169_v38 = vpop.f32.mrf.mxu3 }
 0x70b   : > { %v1173_v39 = vadd.f32 %v1169_v38, %v1055_v37 }
 0x70d   : > { %v1174_v40 = vadd.f32 %v1173_v39, %v1991_v57 }
 0x70f   : > { %v1175_v41 = vsel %vm717_vm3, %v1174_v40, 0.0 }
 0x710   : > { %1176 = vadd.xlane.f32.xlu2 %v1175_v41 }
 0x712   : > { %v1171_v42 = vpop.f32.mrf.mxu3 }
 0x783   : > { %v1177_v49 = vpop.xlane.xlu2 %1176 }
 0x784   : > { %v1185_v50 = vmul.f32 %v1184_v34, %v1177_v49 }
 0x786   : > { %v1186_v51 = vsub.f32 %v1174_v40, %v1185_v50 }
 0x788   : > { %v1187_v52 = vmul.f32 %v1186_v51, %v1186_v51 }
 0x78a   : > { %v1188_v57 = vsel %vm717_vm3, %v1187_v52, 0.0 }
 0x78b   : > { %1189 = vadd.xlane.f32.xlu0 %v1188_v57 }
 0x7fe   : > { %v1190_v53 = vpop.xlane.xlu0 %1189 }
 0x7ff   : > { %v1191_v54 = vmul.f32 %v1190_v53, %v1184_v34 }
 0x801   : > { %v1192_v55 = vadd.f32 1e-08, %v1191_v54 }
 0x803   : > { %1670 = vrsqrt.f32 %v1192_v55  ;;  %vm1199_vm8 = vweird.f32 %v1192_v55 }
 0x809   : > { %v1671_v56 = vpop.eup %1670 }
 0x80a   : > { %v1194_v58 = vmul.f32 %v1671_v56, %v1192_v55  ;;  %vm1200_vm7 = vweird.f32 %v1671_v56 }
 0x80b   : > { %vm1201_vm9 = vmor %vm1199_vm8, %vm1200_vm7 }
 0x80c   : > { %v1195_v59 = vmul.f32 %v1671_v56, %v1194_v58 }
 0x80e   : > { %v1196_v60 = vmul.f32 0.5, %v1195_v59 }
 0x810   : > { %v1197_v61 = vsub.f32 1.5, %v1196_v60 }
 0x812   : > { %v1198_v63 = vmul.f32 %v1671_v56, %v1197_v61 }
 0x814   : > { %v1202_v0 = vsel %vm1201_vm9, %v1671_v56, %v1198_v63 }
 0x815   : > { %v1207_v1 = vmul.f32 %v1650_v62, %v1202_v0 }
 0x817   : > { %v1208_v3 = vmul.f32 %v1207_v1, %v1186_v51 }
 0x819   : > { %v1213_v4 = vadd.f32 %v1651_v2, %v1208_v3 }
 0x81b   : > { %1214 = vst.msk [vmem:[%s377_s16] sm:$0xff] %vm717_vm3, %v1213_v4 }
 0x81c   : > { %1699 = shalt.err (!%p1696_p9)
}
 0x81d   : > { %1578 = dma.vmem_to_hbm [thread:$0]  (%p1870_p3), %s1231_s15, 128, %s1233_s23, %s1216_s11  }
 0x81e PF: > { %s2157_s16 = sld [smem:[#allocation11_spill]] }
 0x81f   : > { %s2158_s29 = sld [smem:[#allocation7_spill]] }
 0x824   : > { %p1584_p10 = scmp.ge.s32.totalorder %s2157_s16, 2 }
 0x825   : > { %s1244_s14 = sand.u32 1, %s2158_s29  }
 0x826   : > { %p1581_p11 = pnand %p1584_p10, %p1879_p8  ;;  %s1245_s27 = scalar_lea.sflag [#allocation5], %s1244_s14 }
 0x828   : > { %p1582_p12 = pneg %p1581_p11 }
 0x82a   : > { %1733 = dma.done.wait (%p1582_p12), %s1245_s27, 128  }
 0x82b   : > { %1735 = vsyncadd (%p1582_p12), %s1245_s27, 4294967168  ;;  %s22_s16 = sadd.s32 1, %s2157_s16   ;;  %s2160_s12 = sld [smem:[#allocation8_spill]] }
 0x82c   : > { %p19_p13 = scmp.ge.s32.totalorder %s22_s16, 6   ;;  %s2161_s11 = sld [smem:[#allocation15_spill]] }
 0x82d   : > { %s2162_s22 = sld [smem:[#allocation9_spill]]  ;;  %s2166_s30 = smov %s1742_s10 }
 0x82e   : > { %s2163_s13 = sld [smem:[#allocation10_spill]] }
 0x82f   : > { %s2164_s14 = sld [smem:[#allocation12_spill]]  ;;  %21 = sbr.rel (!%p19_p13) target bundleno = 5 (0x5), region = 125 }
 0x830   : > { %s2165_s15 = sld [smem:[#allocation13_spill]] }
 0x831   : > { %s2167_s10 = smov %s2160_s12 }
 0x833   : > { %s2168_s12 = smov %s2162_s22 }
 0x834   :  { %1251 = vsyncpa [#allocation5], 1 }
 0x835   :  { %1253 = vsyncpa [#allocation5 + $0x1], 1 }

// kernel: tpu_custom_call.1
= control target key start
LH: loop header
LB: loop body
LE: loop exit
PB: predicated region body
PF: predicated region fallthrough
CT: control target
= control target key end

     0   :  { %14 = vsyncpa [#allocation5], 0  ;;  %s2125_s0 = inlined_call_operand.vmem [shape: f32[2,16,32], index: 0, kind: input, shape index: {}]   ;;  %s2126_s1 = inlined_call_operand.vmem [shape: f32[2,16,32], index: 1, kind: input, shape index: {}]   ;;  %s2127_s2 = inlined_call_operand.vmem [shape: f32[2,16,32], index: 2, kind: input, shape index: {}]   ;;  %s2128_s3 = inlined_call_operand.vmem [shape: bf16[4,32,8], index: 3, kind: input, shape index: {}]   ;;  %s2129_s4 = inlined_call_operand.vmem [shape: bf16[4,32,8], index: 4, kind: input, shape index: {}]   ;;  %s2130_s5 = inlined_call_operand.vmem [shape: bf16[4,32,8], index: 5, kind: input, shape index: {}]   ;;  %s2131_s6 = inlined_call_operand.vmem [shape: bf16[4,8,32], index: 6, kind: input, shape index: {}]   ;;  %s2132_s7 = inlined_call_operand.vmem [shape: f32[1,32], index: 7, kind: input, shape index: {}]   ;;  %s2133_s8 = inlined_call_operand.vmem [shape: f32[1,32], index: 8, kind: input, shape index: {}]   ;;  %s2134_s9 = inlined_call_operand.hbm [shape: f32[2,16,32], index: 9, kind: output, shape index: {}]  }
   0x1   :  { %16 = vsyncpa [#allocation5 + $0x1], 0  ;;  %s1819_s30 = smov 0   ;;  %s1821_s10 = smov 0  }
   0x2   :  { %s1823_s11 = smov 0   ;;  %s1825_s12 = smov 0  }
   0x3   :  { %s1827_s13 = smov 0   ;;  %s1829_s14 = smov 0  }
   0x4   :  { %s1831_s15 = smov 0   ;;  %s1833_s16 = smov 0  }
   0x5 LB: > { %2145 = sst [smem:[#allocation7_spill]] %s1738_s30  ;;  %s1335_s17 = sadd.s32 4294967295, %s1766_s16   ;;  %s1766_s16 = sphi %s1833_s16, %s22_s16   ;;  %s1762_s15 = sphi %s1831_s15, %s2165_s15   ;;  %s1758_s14 = sphi %s1829_s14, %s2164_s14   ;;  %s1754_s13 = sphi %s1827_s13, %s2163_s13   ;;  %s1750_s12 = sphi %s1825_s12, %s2168_s12   ;;  %s1746_s11 = sphi %s1823_s11, %s2161_s11   ;;  %s1742_s10 = sphi %s1821_s10, %s2167_s10   ;;  %s1738_s30 = sphi %s1819_s30, %s2166_s30  }
   0x6   : > { %2146 = sst [smem:[#allocation8_spill]] %s1746_s11  ;;  %s1336_s18 = sadd.s32 4294967294, %s1766_s16  }
   0x7   : > { %2147 = sst [smem:[#allocation9_spill]] %s1758_s14  ;;  %s31_s19 = sadd.s32 1, %s1758_s14 }
   0x8   : > { %2148 = sst [smem:[#allocation10_spill]] %s1762_s15  ;;  %p32_p0 = scmp.ge.s32.totalorder %s31_s19, 2 }
   0x9   : > { %2149 = sst [smem:[#allocation11_spill]] %s1766_s16  ;;  %s34_s20 = sadd.s32 1, %s1762_s15 }
   0xa   : > { %p259_p1 = scmp.ne.s32.totalorder %s1746_s11, %s1742_s10  ;;  %p260_p2 = scmp.eq.s32.totalorder %s1335_s17, 3 }
   0xb   : > { %s2170_s19 = smov (%p32_p0, %s31_s19), 0  ;;  %s2172_s20 = smov (!%p32_p0, %s34_s20), %s1762_s15 }
   0xc   : > { %2150 = sst [smem:[#allocation12_spill]] %s2170_s19  ;;  %s245_s21 = ssub.s32 %s1758_s14, %s2170_s19 }
   0xd   : > { %p1870_p3 = por %p260_p2, %p259_p1  ;;  %p36_p4 = scmp.ge.s32.totalorder %s2172_s20, 2 }
   0xe   : > { %p265_p5 = scmp.ne.s32.totalorder %s1742_s10, %s1738_s30  ;;  %p266_p6 = scmp.eq.s32.totalorder %s1336_s18, 3 }
   0xf   : > { %p1339_p7 = scmp.ge.s32.totalorder %s1766_s16, 1  ;;  %s2174_s20 = smov (%p36_p4, %s2172_s20), 0 }
  0x10   : > { %2152 = sst [smem:[#allocation13_spill]] %s2174_s20  ;;  %p1879_p8 = por %p266_p6, %p265_p5 }
  0x11   : > { %p329_p9 = scmp.lt.s32.totalorder %s1766_s16, 5  ;;  %s244_s24 = ssub.s32 %s1762_s15, %s2174_s20 }
  0x12   : > { %s2153_s23 = scalar_select %p1879_p8, 1, 0 }
  0x13   : > { %s249_s25 = sadd.s32 1, %s1746_s11  ;;  %s246_s26 = sor.u32 %s245_s21, %s244_s24 }
  0x14   : > { %2154 = sst [smem:[#allocation14_spill]] %s2153_s23  ;;  %p330_p10 = pnand %p1339_p7, %p329_p9 }
  0x15   : > { %p247_p11 = scmp.eq.s32.totalorder %s246_s26, 0  ;;  %s2142_s28 = sand.u32 (!%p330_p10), 1, %s1742_s10  }
  0x16   : > { %333 = sbr.rel (%p330_p10) target bundleno = 2078 (0x81e), region = 56  ;;  %p378_p12 = scmp.lt.s32.totalorder (!%p330_p10), %s1754_s13, 1 }
  0x17   : > { %s1888_s27 = scalar_select %p247_p11, %s1746_s11, %s249_s25  }
  0x18   : > { %s1894_s29 = sshll.u32 (!%p330_p10), %s2142_s28, 3  ;;  %p380_p13 = scmp.lt.s32.totalorder (!%p330_p10), %s1750_s12, 1 }
  0x19   : > { %2155 = sst [smem:[#allocation15_spill]] %s1888_s27  ;;  %s377_s16 = scalar_lea.vmem (!%p330_p10), [#allocation4], %s1894_s29 }
  0x1a   : > { %p1347_p0 = scmp.ne.s32.totalorder (!%p330_p10), %s1750_s12, 0 }
  0x1b   : > { %s379_s17 = scalar_select %p378_p12, %s1754_s13, 1 }
  0x1c   : > { %s381_s18 = scalar_select %p380_p13, %s1750_s12, 1 }
  0x1d   : > { %s1341_s21 = sshll.u32 %s379_s17, 1  ;;  %s1544_s24 = sshll.u32 %s379_s17, 4 }
  0x1e   : > { %s383_s25 = sadd.s32 %s1341_s21, %s381_s18  ;;  %s390_s19 = scalar_lea.vmem %s2126_s1, %s1544_s24 }
  0x1f   : > { %s1342_s15 = sshll.u32 %s383_s25, 3  ;;  %s395_s11 = scalar_lea.vmem %s2127_s2, %s1544_s24 }
  0x20   : > { %s1908_s28 = scalar_lea.vmem %s2125_s0, %s1342_s15  ;;  %400 = sbr.rel (%p1347_p0) target bundleno = 207 (0xcf), region = 60 }
  0x25   : > { %v1547_v0 = vld [vmem:[%s2129_s4 + $0x8] sm:$0xff]  ;;  %v1551_v2 = vld [vmem:[%s2129_s4 + $0x18] sm:$0xff]  ;;  %v1546_v4 = vld [vmem:[%s2129_s4] sm:$0xff]  ;;  %vm423_vm0 = vcmask 261120   ;;  %vm443_vm1 = vcmask 60416  }
  0x26   : > { %v1549_v1 = vld [vmem:[%s2130_s5 + $0x8] sm:$0xff]  ;;  %v1553_v3 = vld [vmem:[%s2130_s5 + $0x18] sm:$0xff]  ;;  %v1548_v5 = vld [vmem:[%s2130_s5] sm:$0xff]  ;;  %433 = vmatpush.bf16.msra.mxu0 %v1547_v0  ;;  %506 = vmatpush.bf16.msra.mxu2 %v1551_v2 }
  0x27   : > { %471 = vmatpush.bf16.msra.mxu1 %v1549_v1  ;;  %v1550_v6 = vld [vmem:[%s2129_s4 + $0x10] sm:$0xff]  ;;  %v401_v8 = vld [vmem:[%s390_s19] sm:$0xff]  ;;  %542 = vmatpush.bf16.msra.mxu3 %v1553_v3  ;;  %v402_v9 = vld [vmem:[%s390_s19 + $0x8] sm:$0xff] }
  0x28   : > { %v1552_v7 = vld [vmem:[%s2130_s5 + $0x10] sm:$0xff]  ;;  %v404_v10 = vld [vmem:[%s395_s11] sm:$0xff]  ;;  %v405_v11 = vld [vmem:[%s395_s11 + $0x8] sm:$0xff]  ;;  %v403_v14 = vpack.c.bf16 %v402_v9, %v401_v8 }
  0x29   : > { %v1559_v12 = vld [vmem:[%s2129_s4 + $0x38] sm:$0xff]  ;;  %v406_v15 = vpack.c.bf16 %v405_v11, %v404_v10  ;;  %v1555_v16 = vld [vmem:[%s2129_s4 + $0x28] sm:$0xff]  ;;  %v1558_v18 = vld [vmem:[%s2129_s4 + $0x30] sm:$0xff] }
  0x2a   : > { %v1561_v13 = vld [vmem:[%s2130_s5 + $0x38] sm:$0xff]  ;;  %434 = vmatpush.bf16.msra.mxu0 %v1546_v4  ;;  %507 = vmatpush.bf16.msra.mxu2 %v1550_v6  ;;  %v1557_v17 = vld [vmem:[%s2130_s5 + $0x28] sm:$0xff]  ;;  %v1560_v19 = vld [vmem:[%s2130_s5 + $0x30] sm:$0xff] }
  0x2b   : > { %472 = vmatpush.bf16.msra.mxu1 %v1548_v5  ;;  %543 = vmatpush.bf16.msra.mxu3 %v1552_v7  ;;  %v1554_v20 = vld [vmem:[%s2129_s4 + $0x20] sm:$0xff] }
  0x2c   : > { %v1556_v21 = vld [vmem:[%s2130_s5 + $0x20] sm:$0xff] }
  0x2d   : > { %1356 = vmatmul.msk.bf16.vlgmr.msra.gmra.mxu0 %vm423_vm0, %v403_v14  ;;  %1378 = vmatmul.msk.bf16.vlgmr.msra.gmra.mxu2 %vm423_vm0, %v403_v14 }
  0x2e   : > { %650 = vmatpush.bf16.msrb.mxu2 %v1559_v12  ;;  %1365 = vmatmul.msk.bf16.vlgmr.msra.gmra.mxu1 %vm423_vm0, %v406_v15 }
  0x2f   : > { %686 = vmatpush.bf16.msrb.mxu3 %v1561_v13  ;;  %578 = vmatpush.bf16.msrb.mxu0 %v1555_v16 }
  0x30   : > { %1391 = vmatmul.msk.bf16.vlgmr.msra.gmra.mxu3 %vm423_vm0, %v406_v15  ;;  %614 = vmatpush.bf16.msrb.mxu1 %v1557_v17 }
  0x32   : > { %651 = vmatpush.bf16.msrb.mxu2 %v1558_v18 }
  0x33   : > { %687 = vmatpush.bf16.msrb.mxu3 %v1560_v19  ;;  %579 = vmatpush.bf16.msrb.mxu0 %v1554_v20 }
  0x34   : > { %615 = vmatpush.bf16.msrb.mxu1 %v1556_v21 }
  0x3d   : > { %1404 = vmatmul.msk.bf16.vlgmr.msrb.gmra.mxu0 %vm423_vm0, %v403_v14  ;;  %1430 = vmatmul.msk.bf16.vlgmr.msrb.gmra.mxu2 %vm423_vm0, %v403_v14 }
  0x3e   : > { %1417 = vmatmul.msk.bf16.vlgmr.msrb.gmra.mxu1 %vm423_vm0, %v406_v15 }
  0x40   : > { %1443 = vmatmul.msk.bf16.vlgmr.msrb.gmra.mxu3 %vm423_vm0, %v406_v15 }
  0xaa   : > { %v436_v22 = vpop.f32.mrf.mxu0 }
  0xab   : > { %v474_v23 = vpop.f32.mrf.mxu1  ;;  %v441_v24 = vpack.c.bf16 %v436_v22, %v436_v22 }
  0xac   : > { %v479_v25 = vpack.c.bf16 %v474_v23, %v474_v23 }
  0xad   : > { %444 = vst.msk [vmem:[#allocation2] sm:$0xf] %vm443_vm1, %v441_v24 }
  0xae   : > { %481 = vst.msk [vmem:[#allocation3] sm:$0xf] %vm443_vm1, %v479_v25 }
  0xb0   : > { %v509_v26 = vpop.f32.mrf.mxu2 }
  0xb1   : > { %v514_v28 = vpack.c.bf16 %v509_v26, %v509_v26 }
  0xb2   : > { %v438_v30 = vpop.f32.mrf.mxu0 }
  0xb3   : > { %v545_v27 = vpop.f32.mrf.mxu3  ;;  %v476_v31 = vpop.f32.mrf.mxu1  ;;  %v442_v32 = vpack.c.bf16 %v438_v30, %v438_v30  ;;  %517 = vst.msk [vmem:[#allocation2 + $0x8] sm:$0xf] %vm443_vm1, %v514_v28 }
  0xb4   : > { %v550_v29 = vpack.c.bf16 %v545_v27, %v545_v27  ;;  %v480_v33 = vpack.c.bf16 %v476_v31, %v476_v31 }
  0xb5   : > { %445 = vst.msk [vmem:[#allocation2 + $0x4] sm:$0xf] %vm443_vm1, %v442_v32 }
  0xb6   : > { %553 = vst.msk [vmem:[#allocation3 + $0x8] sm:$0xf] %vm443_vm1, %v550_v29 }
  0xb7   : > { %482 = vst.msk [vmem:[#allocation3 + $0x4] sm:$0xf] %vm443_vm1, %v480_v33 }
  0xb8   : > { %v511_v34 = vpop.f32.mrf.mxu2 }
  0xb9   : > { %v515_v36 = vpack.c.bf16 %v511_v34, %v511_v34 }
  0xba   : > { %v581_v38 = vpop.f32.mrf.mxu0 }
  0xbb   : > { %v547_v35 = vpop.f32.mrf.mxu3  ;;  %v617_v39 = vpop.f32.mrf.mxu1  ;;  %v586_v40 = vpack.c.bf16 %v581_v38, %v581_v38  ;;  %518 = vst.msk [vmem:[#allocation2 + $0xc] sm:$0xf] %vm443_vm1, %v515_v36 }
  0xbc   : > { %v551_v37 = vpack.c.bf16 %v547_v35, %v547_v35  ;;  %v622_v41 = vpack.c.bf16 %v617_v39, %v617_v39 }
  0xbd   : > { %589 = vst.msk [vmem:[#allocation2 + $0x10] sm:$0xf] %vm443_vm1, %v586_v40 }
  0xbe   : > { %554 = vst.msk [vmem:[#allocation3 + $0xc] sm:$0xf] %vm443_vm1, %v551_v37 }
  0xbf   : > { %625 = vst.msk [vmem:[#allocation3 + $0x10] sm:$0xf] %vm443_vm1, %v622_v41 }
  0xc0   : > { %v653_v42 = vpop.f32.mrf.mxu2 }
  0xc1   : > { %v658_v44 = vpack.c.bf16 %v653_v42, %v653_v42 }
  0xc2   : > { %v583_v46 = vpop.f32.mrf.mxu0 }
  0xc3   : > { %v689_v43 = vpop.f32.mrf.mxu3  ;;  %v619_v47 = vpop.f32.mrf.mxu1  ;;  %v587_v48 = vpack.c.bf16 %v583_v46, %v583_v46  ;;  %661 = vst.msk [vmem:[#allocation2 + $0x18] sm:$0xf] %vm443_vm1, %v658_v44 }
  0xc4   : > { %v694_v45 = vpack.c.bf16 %v689_v43, %v689_v43  ;;  %v623_v49 = vpack.c.bf16 %v619_v47, %v619_v47 }
  0xc5   : > { %590 = vst.msk [vmem:[#allocation2 + $0x14] sm:$0xf] %vm443_vm1, %v587_v48 }
  0xc6   : > { %697 = vst.msk [vmem:[#allocation3 + $0x18] sm:$0xf] %vm443_vm1, %v694_v45 }
  0xc7   : > { %626 = vst.msk [vmem:[#allocation3 + $0x14] sm:$0xf] %vm443_vm1, %v623_v49 }
  0xc8   : > { %v655_v50 = vpop.f32.mrf.mxu2 }
  0xc9   : > { %v659_v52 = vpack.c.bf16 %v655_v50, %v655_v50 }
  0xcb   : > { %v691_v51 = vpop.f32.mrf.mxu3  ;;  %662 = vst.msk [vmem:[#allocation2 + $0x1c] sm:$0xf] %vm443_vm1, %v659_v52 }
  0xcc   : > { %v695_v53 = vpack.c.bf16 %v691_v51, %v691_v51 }
  0xce   : > { %698 = vst.msk [vmem:[#allocation3 + $0x1c] sm:$0xf] %vm443_vm1, %v695_v53 }
  0xcf PF: > { %v1563_v54 = vld [vmem:[%s2128_s3 + $0x8] sm:$0xff]  ;;  %vm744_vm2 = vcmask 64512   ;;  %v1564_v55 = vld [vmem:[#allocation2] sm:$0xff]  ;;  %vm717_vm3 = vcmask 261120   ;;  %vm764_vm4 = vcmask 130048   ;;  %v1567_v2 = vld [vmem:[%s2128_s3 + $0x18] sm:$0xff] }
  0xd0   : > { %727 = vmatpush.bf16.msra.mxu0 %v1563_v54  ;;  %v1562_v56 = vld [vmem:[%s2128_s3] sm:$0xff]  ;;  %v749_v58 = vsel %vm744_vm2, %v1564_v55, 0  ;;  %824 = vmatpush.bf16.msra.mxu3 %v1567_v2  ;;  %v1566_v3 = vld [vmem:[%s2128_s3 + $0x10] sm:$0xff]  ;;  %v1568_v10 = vld [vmem:[#allocation2 + $0x8] sm:$0xff]  ;;  %vm902_vm5 = vcmask 1043456   ;;  %s1540_s17 = sshll.u32 %s1754_s13, 1 }
  0xd1   : > { %v1991_v57 = vld [vmem:[%s1908_s28] sm:$0xff]  ;;  %758 = vmatpush.bf16.xpose.msra.mxu1 %v749_v58  ;;  %v847_v11 = vsel %vm744_vm2, %v1568_v10, 0  ;;  %v1571_v27 = vld [vmem:[%s2128_s3 + $0x28] sm:$0xff]  ;;  %v1575_v29 = vld [vmem:[%s2128_s3 + $0x38] sm:$0xff]  ;;  %s1226_s18 = sadd.s32 %s1750_s12, %s1540_s17  ;;  %s1230_s15 = sshll.u32 %s377_s16, 4  ;;  %s1231_s15 = int_to_ptr.vmem [resolvable:$true] %s1230_s15 }
  0xd2   : > { %v1996_v59 = vpack.c.bf16 %v1991_v57, %v1991_v57  ;;  %v1565_v9 = vld [vmem:[#allocation3] sm:$0xff]  ;;  %v1569_v30 = vld [vmem:[#allocation3 + $0x8] sm:$0xff]  ;;  %v1574_v31 = vld [vmem:[%s2128_s3 + $0x30] sm:$0xff]  ;;  %s1541_s20 = sshll.u32 %s1226_s18, 3  ;;  %s2156_s28 = sand.u32 1, %s1742_s10  }
  0xd3   : > { %793 = vmatpush.bf16.msra.mxu2 %v1565_v9  ;;  %v800_v19 = vld [vmem:[%s2131_s6] sm:$0xf]  ;;  %v1572_v39 = vld [vmem:[#allocation2 + $0x10] sm:$0xff]  ;;  %v1576_v45 = vld [vmem:[#allocation2 + $0x18] sm:$0xff]  ;;  %s1228_s30 = scalar_lea.hbm %s2134_s9, %s1541_s20  ;;  %s1216_s11 = scalar_lea.sflag [#allocation5], %s2156_s28 }
  0xd4   : > { %728 = vmatpush.bf16.msra.mxu0 %v1562_v56  ;;  %825 = vmatpush.bf16.msra.mxu3 %v1566_v3  ;;  %v923_v20 = vsel %vm902_vm5, %v800_v19, 0  ;;  %v1570_v28 = vld [vmem:[%s2128_s3 + $0x20] sm:$0xff]  ;;  %v984_v40 = vsel %vm744_vm2, %v1572_v39, 0  ;;  %v1102_v50 = vsel %vm744_vm2, %v1576_v45, 0  ;;  %v1573_v2 = vld [vmem:[#allocation3 + $0x10] sm:$0xff]  ;;  %s1232_s23 = sshll.u32 %s1228_s30, 4  ;;  %s1233_s23 = int_to_ptr.hbm [resolvable:$true] %s1232_s23 }
  0xd5   : > { %v1486_v53 = vld [vmem:[%s2131_s6 + $0x4] sm:$0xf]  ;;  %s1686_s19 = sshra.s32 %s1233_s23, 4  ;;  %s1692_s18 = scalar_lea.hbm %s2134_s9, 32  ;;  %s1687_s19 = int_to_ptr.hbm [resolvable:$true] %s1686_s19 }
  0xd6   : > { %v904_v54 = vsel %vm902_vm5, %v1486_v53, 0  ;;  %s1688_s24 = scalar_lea.hbm %s1687_s19, 8  ;;  %p1693_p5 = scmp.lt.s32.totalorder %s1687_s19, %s2134_s9 }
  0xd7   : > { %1452 = vmatmul.msk.bf16.vlgmr.msra.gmra.mxu0 %vm717_vm3, %v1996_v59  ;;  %1475 = vmatmul.msk.bf16.vlgmr.msra.gmra.mxu3 %vm717_vm3, %v1996_v59  ;;  %p1689_p1 = scmp.ne.s32.totalorder %s1687_s19, %s1688_s24  ;;  %p1694_p6 = scmp.lt.s32.totalorder %s1692_s18, %s1688_s24 }
  0xd8   : > { %856 = vmatpush.bf16.xpose.msrb.mxu2 %v847_v11  ;;  %932 = vmatpush.bf16.msrb.mxu3 %v923_v20 }
  0xd9   : > { %890 = vmatpush.bf16.msrb.mxu0 %v1569_v30  ;;  %913 = vmatpush.bf16.msrb.mxu1 %v904_v54  ;;  %p1690_p2 = pnand %p1689_p1, %p1870_p3  ;;  %p1695_p7 = por %p1694_p6, %p1693_p5 }
  0xdb   : > { %p1691_p4 = pneg %p1690_p2 }
  0xdd   : > { %993 = vmatpush.bf16.xpose.msra.mxu0 %v984_v40  ;;  %p1696_p9 = pnand %p1695_p7, %p1691_p4 }
 0x154   : > { %v730_v60 = vpop.f32.mrf.mxu0 }
 0x155   : > { %v738_v61 = vpack.c.bf16 %v730_v60, %v730_v60 }
 0x157   : > { %1457 = vmatmul.msk.bf16.vlgmr.msra.gmra.mxu1 %vm744_vm2, %v738_v61 }
 0x158   : > { %1027 = vmatpush.bf16.msra.mxu1 %v1573_v2  ;;  %v1651_v2 = vld [vmem:[%s2133_s8] ss:$0 sm:$0xff] }
 0x15a   : > { %v827_v12 = vpop.f32.mrf.mxu3 }
 0x15b   : > { %v837_v18 = vpack.c.bf16 %v827_v12, %v827_v12 }
 0x15c   : > { %v732_v62 = vpop.f32.mrf.mxu0 }
 0x162   : > { %v829_v13 = vpop.f32.mrf.mxu3 }
 0x1d4   : > { %v760_v63 = vpop.f32.mrf.mxu1 }
 0x1d5   : > { %v765_v0 = vsel %vm764_vm4, %v760_v63, -inf }
 0x1d6   : > { %766 = vmax.xlane.f32.xlu0 %v765_v0 }
 0x1dc   : > { %v762_v1 = vpop.f32.mrf.mxu1 }
 0x249   : > { %v767_v4 = vpop.xlane.xlu0 %766 }
 0x24a   : > { %v768_v5 = vsub.f32 %v760_v63, %v767_v4 }
 0x24c   : > { %v769_v6 = vmul.f32 1.442695, %v768_v5 }
 0x24e   : > { %1652 = vpow2.f32 %v769_v6 }
 0x254   : > { %v1653_v7 = vpop.eup %1652 }
 0x255   : > { %v771_v8 = vsel %vm764_vm4, %v1653_v7, 0.0 }
 0x256   : > { %772 = vadd.xlane.f32.xlu0 %v771_v8 }
 0x2c9   : > { %v773_v14 = vpop.xlane.xlu0 %772 }
 0x2ca   : > { %1654 = vrcp.f32 %v773_v14  ;;  %v1577_v14 = vld [vmem:[#allocation3 + $0x18] sm:$0xff] }
 0x2d0   : > { %v1655_v15 = vpop.eup %1654 }
 0x2d1   : > { %v775_v16 = vmul.f32 %v1655_v15, %v1653_v7  ;;  %v1512_v15 = vld [vmem:[%s2131_s6 + $0x8] sm:$0xf] }
 0x2d3   : > { %v776_v17 = vpack.c.bf16 %v775_v16, %v775_v16  ;;  %v1040_v16 = vsel %vm902_vm5, %v1512_v15, 0 }
 0x2d4   : > { %1049 = vmatpush.bf16.msra.mxu3 %v1040_v16 }
 0x2d5   : > { %1462 = vmatmul.msk.bf16.vlgmr.msra.gmra.mxu2 %vm764_vm4, %v776_v17 }
 0x2d6   : > { %961 = vmatpush.bf16.msra.mxu2 %v1571_v27 }
 0x2da   : > { %962 = vmatpush.bf16.msra.mxu2 %v1570_v28 }
 0x2e5   : > { %1480 = vmatmul.msk.bf16.vlgmr.msrb.gmra.mxu2 %vm744_vm2, %v837_v18 }
 0x2e6   : > { %1079 = vmatpush.bf16.msrb.mxu2 %v1575_v29 }
 0x2ea   : > { %1080 = vmatpush.bf16.msrb.mxu2 %v1574_v31 }
 0x2f5   : > { %1501 = vmatmul.msk.bf16.vlgmr.msra.gmra.mxu2 %vm717_vm3, %v1996_v59 }
 0x305   : > { %1526 = vmatmul.msk.bf16.vlgmr.msrb.gmra.mxu2 %vm717_vm3, %v1996_v59 }
 0x358   : > { %v795_v21 = vpop.f32.mrf.mxu2 }
 0x359   : > { %v799_v22 = vpack.c.bf16 %v795_v21, %v795_v21 }
 0x35b   : > { %1488 = vmatmul.msk.bf16.vlgmr.msrb.gmra.mxu3 %vm744_vm2, %v799_v22 }
 0x360   : > { %v797_v23 = vpop.f32.mrf.mxu2 }
 0x368   : > { %v858_v24 = vpop.f32.mrf.mxu2 }
 0x369   : > { %v862_v25 = vsel %vm764_vm4, %v858_v24, -inf }
 0x36a   : > { %863 = vmax.xlane.f32.xlu1 %v862_v25  ;;  %v1537_v25 = vld [vmem:[%s2131_s6 + $0xc] sm:$0xf] }
 0x370   : > { %v860_v26 = vpop.f32.mrf.mxu2 }
 0x371   : > { %v1158_v26 = vsel %vm902_vm5, %v1537_v25, 0 }
 0x372   : > { %1167 = vmatpush.bf16.msrb.mxu3 %v1158_v26 }
 0x378   : > { %v964_v41 = vpop.f32.mrf.mxu2 }
 0x379   : > { %v974_v51 = vpack.c.bf16 %v964_v41, %v964_v41 }
 0x380   : > { %v966_v42 = vpop.f32.mrf.mxu2 }
 0x388   : > { %v1082_v44 = vpop.f32.mrf.mxu2 }
 0x389   : > { %v1092_v52 = vpack.c.bf16 %v1082_v44, %v1082_v44 }
 0x390   : > { %v1084_v48 = vpop.f32.mrf.mxu2 }
 0x3dd   : > { %v864_v32 = vpop.xlane.xlu1 %863 }
 0x3de   : > { %v865_v33 = vsub.f32 %v858_v24, %v864_v32  ;;  %v2036_v34 = vpop.f32.mrf.mxu3 }
 0x3e0   : > { %v866_v35 = vmul.f32 1.442695, %v865_v33 }
 0x3e2   : > { %1656 = vpow2.f32 %v866_v35 }
 0x3e6   : > { %v936_v36 = vpop.f32.mrf.mxu3 }
 0x3e8   : > { %v1657_v37 = vpop.eup %1656 }
 0x3e9   : > { %v868_v38 = vsel %vm764_vm4, %v1657_v37, 0.0 }
 0x3ea   : > { %869 = vadd.xlane.f32.xlu1 %v868_v38 }
 0x45d   : > { %v870_v43 = vpop.xlane.xlu1 %869 }
 0x45e   : > { %1658 = vrcp.f32 %v870_v43  ;;  %v1768_v43 = vmov 32.0  }
 0x464   : > { %v1659_v46 = vpop.eup %1658 }
 0x465   : > { %v872_v47 = vmul.f32 %v1659_v46, %v1657_v37 }
 0x467   : > { %v873_v49 = vpack.c.bf16 %v872_v47, %v872_v47 }
 0x469   : > { %1485 = vmatmul.msk.bf16.vlgmr.msrb.gmra.mxu0 %vm764_vm4, %v873_v49 }
 0x46a   : > { %1111 = vmatpush.bf16.xpose.msrb.mxu0 %v1102_v50 }
 0x479   : > { %1506 = vmatmul.msk.bf16.vlgmr.msra.gmra.mxu0 %vm744_vm2, %v974_v51 }
 0x489   : > { %1531 = vmatmul.msk.bf16.vlgmr.msrb.gmra.mxu0 %vm744_vm2, %v1092_v52 }
 0x4e6   : > { %v892_v55 = vpop.f32.mrf.mxu0 }
 0x4e7   : > { %v896_v56 = vpack.c.bf16 %v892_v55, %v892_v55 }
 0x4e9   : > { %1487 = vmatmul.msk.bf16.vlgmr.msrb.gmra.mxu1 %vm744_vm2, %v896_v56 }
 0x4ea   : > { %1145 = vmatpush.bf16.msrb.mxu1 %v1577_v14 }
 0x4ee   : > { %v894_v58 = vpop.f32.mrf.mxu0 }
 0x4f6   : > { %v995_v59 = vpop.f32.mrf.mxu0 }
 0x4f7   : > { %v999_v60 = vsel %vm764_vm4, %v995_v59, -inf }
 0x4f8   : > { %1000 = vmax.xlane.f32.xlu2 %v999_v60 }
 0x4fe   : > { %v997_v61 = vpop.f32.mrf.mxu0 }
 0x506   : > { %v1113_v62 = vpop.f32.mrf.mxu0 }
 0x507   : > { %v1117_v63 = vsel %vm764_vm4, %v1113_v62, -inf }
 0x508   : > { %1118 = vmax.xlane.f32.xlu2 %v1117_v63 }
 0x50e   : > { %v1115_v0 = vpop.f32.mrf.mxu0 }
 0x566   : > { %v915_v1 = vpop.f32.mrf.mxu1 }
 0x567   : > { %v935_v36 = vadd.f32 %v2036_v34, %v915_v1 }
 0x56b   : > { %v1001_v3 = vpop.xlane.xlu2 %1000 }
 0x56c   : > { %v1002_v4 = vsub.f32 %v995_v59, %v1001_v3 }
 0x56e   : > { %v1003_v5 = vmul.f32 1.442695, %v1002_v4  ;;  %v917_v6 = vpop.f32.mrf.mxu1 }
 0x570   : > { %1660 = vpow2.f32 %v1003_v5 }
 0x576   : > { %v1661_v7 = vpop.eup %1660 }
 0x577   : > { %v1005_v8 = vsel %vm764_vm4, %v1661_v7, 0.0 }
 0x578   : > { %1006 = vadd.xlane.f32.xlu0 %v1005_v8 }
 0x57b   : > { %v1119_v9 = vpop.xlane.xlu2 %1118 }
 0x57c   : > { %v1120_v10 = vsub.f32 %v1113_v62, %v1119_v9  ;;  %v1650_v62 = vld [vmem:[%s2132_s7] ss:$0 sm:$0xff] }
 0x57e   : > { %v1121_v11 = vmul.f32 1.442695, %v1120_v10 }
 0x580   : > { %1662 = vpow2.f32 %v1121_v11 }
 0x586   : > { %v1663_v12 = vpop.eup %1662 }
 0x587   : > { %v1123_v13 = vsel %vm764_vm4, %v1663_v12, 0.0 }
 0x588   : > { %1124 = vadd.xlane.f32.xlu1 %v1123_v13 }
 0x5eb   : > { %v1007_v17 = vpop.xlane.xlu0 %1006 }
 0x5ec   : > { %1664 = vrcp.f32 %v1007_v17 }
 0x5f2   : > { %v1665_v18 = vpop.eup %1664 }
 0x5f3   : > { %v1009_v19 = vmul.f32 %v1665_v18, %v1661_v7 }
 0x5f5   : > { %v1010_v20 = vpack.c.bf16 %v1009_v19, %v1009_v19 }
 0x5f7   : > { %1511 = vmatmul.msk.bf16.vlgmr.msra.gmra.mxu1 %vm764_vm4, %v1010_v20 }
 0x5fb   : > { %v1125_v21 = vpop.xlane.xlu1 %1124 }
 0x5fc   : > { %1666 = vrcp.f32 %v1125_v21 }
 0x5fd   : > { %1668 = vrcp.f32 %v1768_v43 }
 0x602   : > { %v1667_v22 = vpop.eup %1666 }
 0x603   : > { %v1127_v23 = vmul.f32 %v1667_v22, %v1663_v12  ;;  %v1669_v44 = vpop.eup %1668 }
 0x604   : > { %v1179_v45 = vmul.f32 32.0, %v1669_v44  ;;  %vm1183_vm6 = vweird.f32 %v1669_v44 }
 0x605   : > { %v1128_v24 = vpack.c.bf16 %v1127_v23, %v1127_v23 }
 0x606   : > { %v1180_v46 = vsub.f32 1.0, %v1179_v45 }
 0x607   : > { %1536 = vmatmul.msk.bf16.vlgmr.msrb.gmra.mxu1 %vm764_vm4, %v1128_v24 }
 0x608   : > { %v1181_v47 = vmul.f32 %v1669_v44, %v1180_v46 }
 0x60a   : > { %v1182_v48 = vadd.f32 %v1669_v44, %v1181_v47 }
 0x60c   : > { %v1184_v34 = vsel %vm1183_vm6, %v1669_v44, %v1182_v48 }
 0x674   : > { %v1029_v27 = vpop.f32.mrf.mxu1 }
 0x675   : > { %v1033_v28 = vpack.c.bf16 %v1029_v27, %v1029_v27 }
 0x677   : > { %1513 = vmatmul.msk.bf16.vlgmr.msra.gmra.mxu3 %vm744_vm2, %v1033_v28 }
 0x67c   : > { %v1031_v29 = vpop.f32.mrf.mxu1 }
 0x684   : > { %v1147_v30 = vpop.f32.mrf.mxu1 }
 0x685   : > { %v1151_v31 = vpack.c.bf16 %v1147_v30, %v1147_v30 }
 0x687   : > { %1538 = vmatmul.msk.bf16.vlgmr.msrb.gmra.mxu3 %vm744_vm2, %v1151_v31 }
 0x68c   : > { %v1149_v32 = vpop.f32.mrf.mxu1 }
 0x6fa   : > { %v1051_v33 = vpop.f32.mrf.mxu3 }
 0x6fb   : > { %v1055_v37 = vadd.f32 %v1051_v33, %v935_v36 }
 0x702   : > { %v1053_v35 = vpop.f32.mrf.mxu3 }
 0x70a   : > { %v1169_v38 = vpop.f32.mrf.mxu3 }
 0x70b   : > { %v1173_v39 = vadd.f32 %v1169_v38, %v1055_v37 }
 0x70d   : > { %v1174_v40 = vadd.f32 %v1173_v39, %v1991_v57 }
 0x70f   : > { %v1175_v41 = vsel %vm717_vm3, %v1174_v40, 0.0 }
 0x710   : > { %1176 = vadd.xlane.f32.xlu2 %v1175_v41 }
 0x712   : > { %v1171_v42 = vpop.f32.mrf.mxu3 }
 0x783   : > { %v1177_v49 = vpop.xlane.xlu2 %1176 }
 0x784   : > { %v1185_v50 = vmul.f32 %v1184_v34, %v1177_v49 }
 0x786   : > { %v1186_v51 = vsub.f32 %v1174_v40, %v1185_v50 }
 0x788   : > { %v1187_v52 = vmul.f32 %v1186_v51, %v1186_v51 }
 0x78a   : > { %v1188_v57 = vsel %vm717_vm3, %v1187_v52, 0.0 }
 0x78b   : > { %1189 = vadd.xlane.f32.xlu0 %v1188_v57 }
 0x7fe   : > { %v1190_v53 = vpop.xlane.xlu0 %1189 }
 0x7ff   : > { %v1191_v54 = vmul.f32 %v1190_v53, %v1184_v34 }
 0x801   : > { %v1192_v55 = vadd.f32 1e-08, %v1191_v54 }
 0x803   : > { %1670 = vrsqrt.f32 %v1192_v55  ;;  %vm1199_vm8 = vweird.f32 %v1192_v55 }
 0x809   : > { %v1671_v56 = vpop.eup %1670 }
 0x80a   : > { %v1194_v58 = vmul.f32 %v1671_v56, %v1192_v55  ;;  %vm1200_vm7 = vweird.f32 %v1671_v56 }
 0x80b   : > { %vm1201_vm9 = vmor %vm1199_vm8, %vm1200_vm7 }
 0x80c   : > { %v1195_v59 = vmul.f32 %v1671_v56, %v1194_v58 }
 0x80e   : > { %v1196_v60 = vmul.f32 0.5, %v1195_v59 }
 0x810   : > { %v1197_v61 = vsub.f32 1.5, %v1196_v60 }
 0x812   : > { %v1198_v63 = vmul.f32 %v1671_v56, %v1197_v61 }
 0x814   : > { %v1202_v0 = vsel %vm1201_vm9, %v1671_v56, %v1198_v63 }
 0x815   : > { %v1207_v1 = vmul.f32 %v1650_v62, %v1202_v0 }
 0x817   : > { %v1208_v3 = vmul.f32 %v1207_v1, %v1186_v51 }
 0x819   : > { %v1213_v4 = vadd.f32 %v1651_v2, %v1208_v3 }
 0x81b   : > { %1214 = vst.msk [vmem:[%s377_s16] sm:$0xff] %vm717_vm3, %v1213_v4 }
 0x81c   : > { %1699 = shalt.err (!%p1696_p9)
}
 0x81d   : > { %1578 = dma.vmem_to_hbm [thread:$0]  (%p1870_p3), %s1231_s15, 128, %s1233_s23, %s1216_s11  }
 0x81e PF: > { %s2157_s16 = sld [smem:[#allocation11_spill]] }
 0x81f   : > { %s2158_s29 = sld [smem:[#allocation7_spill]] }
 0x824   : > { %p1584_p10 = scmp.ge.s32.totalorder %s2157_s16, 2 }
 0x825   : > { %s1244_s14 = sand.u32 1, %s2158_s29  }
 0x826   : > { %p1581_p11 = pnand %p1584_p10, %p1879_p8  ;;  %s1245_s27 = scalar_lea.sflag [#allocation5], %s1244_s14 }
 0x828   : > { %p1582_p12 = pneg %p1581_p11 }
 0x82a   : > { %1733 = dma.done.wait (%p1582_p12), %s1245_s27, 128  }
 0x82b   : > { %1735 = vsyncadd (%p1582_p12), %s1245_s27, 4294967168  ;;  %s22_s16 = sadd.s32 1, %s2157_s16   ;;  %s2160_s12 = sld [smem:[#allocation8_spill]] }
 0x82c   : > { %p19_p13 = scmp.ge.s32.totalorder %s22_s16, 6   ;;  %s2161_s11 = sld [smem:[#allocation15_spill]] }
 0x82d   : > { %s2162_s22 = sld [smem:[#allocation9_spill]]  ;;  %s2166_s30 = smov %s1742_s10 }
 0x82e   : > { %s2163_s13 = sld [smem:[#allocation10_spill]] }
 0x82f   : > { %s2164_s14 = sld [smem:[#allocation12_spill]]  ;;  %21 = sbr.rel (!%p19_p13) target bundleno = 5 (0x5), region = 125 }
 0x830   : > { %s2165_s15 = sld [smem:[#allocation13_spill]] }
 0x831   : > { %s2167_s10 = smov %s2160_s12 }
 0x833   : > { %s2168_s12 = smov %s2162_s22 }
 0x834   :  { %1251 = vsyncpa [#allocation5], 1 }
 0x835   :  { %1253 = vsyncpa [#allocation5 + $0x1], 1 }

</bundles_post_ra>
